<compile_context>
chip_gen: v7x
topology: tpu7x:2x2x1
jax: 0.10.0
libtpu: 0.0.40
codegen_flags: <defaults>
</compile_context>

<pallas_src>
import functools

import jax
import jax.numpy as jnp
from jax import lax
from jax.experimental import pallas as pl
from jax.experimental.pallas import tpu as pltpu


def _vmem_limit_bytes():
    # Generation-aware scoped-VMEM limit (perf review): ~96 MiB on v5e/v6e (128 MiB
    # physical), ~48 MiB on v7x (64 MiB physical).  Falls back to a safe 48 MiB.
    try:
        cap = int(pltpu.get_tpu_info().vmem_capacity_bytes)
    except Exception:
        cap = 64 << 20
    return max(32 << 20, min((cap * 3) // 4, 100 << 20))


# ------------------------------ ConvNetEncoder kernel ------------------------------

def _convnet_encoder_kernel(L_valid, L_pad, C2, x_ref, *refs):
    """x_ref: (bt*L_pad, D) bf16; refs: 4 layers x (w_m1, w_0, w_p1, b), then out_ref.

    w_*: (Cin, Cout) bf16 per-tap weights; b: (1, Cout) f32; out_ref: (bt, 4*C2) f32.
    """
    out_ref = refs[-1]
    w_refs = refs[:-1]
    n_layers = len(w_refs) // 4

    M = x_ref.shape[0]          # bt * L_pad flattened (sentence, time) rows
    bt = M // L_pad

    # Sentence-boundary masks for the time shifts (hoisted once, shared by all layers).
    pos = lax.broadcasted_iota(jnp.int32, (M, 1), 0) % L_pad
    is_first = pos == 0                 # the x[t-1] tap would cross the sentence start
    is_last = pos == (L_valid - 1)      # the x[t+1] tap would cross the sentence end
    in_pad = (pos >= L_valid) if L_pad != L_valid else None

    h = x_ref[...]                      # bf16 activations between layers
    for k in range(n_layers):
        wm_ref, w0_ref, wp_ref, b_ref = w_refs[4 * k:4 * k + 4]
        # Three accumulating MXU dots (no tap concatenate).  The +-1 time shifts are
        # applied to the f32 partial products via XLU roll + boundary masking, which is
        # identical to zero-padding the conv input.
        z0 = jnp.dot(h, w0_ref[...], preferred_element_type=jnp.float32)
        zm = jnp.dot(h, wm_ref[...], preferred_element_type=jnp.float32)
        zp = jnp.dot(h, wp_ref[...], preferred_element_type=jnp.float32)
        y = (z0
             + jnp.where(is_first, 0.0, pltpu.roll(zm, 1, 0))       # + W[-1] x[t-1]
             + jnp.where(is_last, 0.0, pltpu.roll(zp, M - 1, 0))    # + W[+1] x[t+1]
             + b_ref[...])
        y = jnp.maximum(y, 0.0)                                      # (M, C2) f32
        if in_pad is not None:
            # Keep padded time rows at exactly 0 so they neither win the max (post-ReLU
            # values are >= 0) nor leak into the next layer's taps.
            y = jnp.where(in_pad, 0.0, y)

        # Per-sentence max over time: one batched reduce + one lane-dense slab store
        # (L_pad % 8 == 0, so the reshape is a pure re-tiling, not a VMEM copy).
        m = jnp.max(y.reshape(bt, L_pad, C2), axis=1)                # (bt, C2) f32
        out_ref[:, k * C2:(k + 1) * C2] = m.astype(out_ref.dtype)

        if k + 1 < n_layers:
            h = y.astype(jnp.bfloat16)   # single cast per layer; bf16 between layers


def convnet_encoder(x_bld, conv_params, *, num_batch_tiles=None):
    """x_bld: (SB, L, D) f32 -> emb: (SB, 4*C2) f32  (4*C2 == 8*enc_lstm_dim)."""
    SB, L, D = x_bld.shape
    C2 = conv_params[0][0].shape[0]           # 2 * enc_lstm_dim

    # Pad the time axis to a multiple of 8 so per-sentence slabs sit on (8,128)
    # sublane-tile boundaries; padded rows are masked inside the kernel.
    L_pad = ((L + 7) // 8) * 8
    if L_pad != L:
        x_bld = jnp.pad(x_bld, ((0, 0), (0, L_pad - L), (0, 0)))

    if num_batch_tiles is None:
        # Default: one big grid step (the grid is a serial loop on single-TC v5e/v6e);
        # only split when every tile keeps the output block second-minor dim a
        # multiple of 8 (the (8,128) BlockSpec rule).
        # TODO(synk): make this generation-aware -- on v7x (2 TensorCores) prefer >= 2
        # "parallel" steps and shrink bt so the working set fits its 64 MiB VMEM.
        num_batch_tiles = 2 if (SB % 2 == 0 and (SB // 2) % 8 == 0) else 1
    assert SB % num_batch_tiles == 0
    bt = SB // num_batch_tiles
    assert bt == SB or bt % 8 == 0, "tile batch must be a multiple of 8 or the full batch"

    # bf16 operands (halves HBM->VMEM bytes); accumulation stays f32 inside the kernel.
    x = x_bld.reshape(SB * L_pad, D).astype(jnp.bfloat16)

    args = [x]
    in_specs = [pl.BlockSpec((bt * L_pad, D), lambda i: (i, 0))]
    # TODO(synk): at real InferSent sizes (C2 = 4096) whole-layer weights do not fit
    # VMEM (v7x: 64 MiB); keep them in HBM (memory_space=pl.ANY) and stream Cout tiles
    # with pltpu.emit_pipeline / manual double-buffered DMA, and mark these
    # constant-index specs pipeline_mode=pl.Buffered(1) so they are not double-buffered.
    # TODO(synk): pad D / Cin to multiples of 128 at production sizes (e.g. 300 -> 384)
    # for aligned MXU K tiles.
    for w, b in conv_params:
        cout, cin, _ = w.shape
        for tap in range(3):              # PyTorch (Cout, Cin, 3): tap 0/1/2 = t-1/t/t+1
            wt = jnp.transpose(w[:, :, tap]).astype(jnp.bfloat16)   # (Cin, Cout)
            args.append(wt)
            in_specs.append(pl.BlockSpec(wt.shape, lambda i: (0, 0)))
        bk = b.reshape(1, cout).astype(jnp.float32)
        args.append(bk)
        in_specs.append(pl.BlockSpec(bk.shape, lambda i: (0, 0)))

    kernel = functools.partial(_convnet_encoder_kernel, L, L_pad, C2)
    return pl.pallas_call(
        kernel,
        out_shape=jax.ShapeDtypeStruct((SB, 4 * C2), jnp.float32),
        grid_spec=pltpu.PrefetchScalarGridSpec(
            num_scalar_prefetch=0,
            grid=(num_batch_tiles,),
            in_specs=in_specs,
            out_specs=pl.BlockSpec((bt, 4 * C2), lambda i: (i, 0)),
        ),
        compiler_params=pltpu.CompilerParams(
            dimension_semantics=("parallel",),
            vmem_limit_bytes=_vmem_limit_bytes(),
        ),
    )(*args)


# ------------------------- feature combination + classifier ------------------------

def _nli_head_kernel(u_ref, v_ref, w1u_ref, w1v_ref, w1a_ref, w1p_ref, b1_ref,
                     w2_ref, b2_ref, w3_ref, b3_ref, out_ref):
    u = u_ref[...]
    v = v_ref[...]
    bf16 = jnp.bfloat16
    # features = cat(u, v, |u - v|, u * v) is never materialised: w1 was pre-split into
    # the 4 matching K-blocks and the partial dots accumulate in f32.
    h = jnp.dot(u.astype(bf16), w1u_ref[...], preferred_element_type=jnp.float32)
    h = h + jnp.dot(v.astype(bf16), w1v_ref[...], preferred_element_type=jnp.float32)
    h = h + jnp.dot(jnp.abs(u - v).astype(bf16), w1a_ref[...],
                    preferred_element_type=jnp.float32)
    h = h + jnp.dot((u * v).astype(bf16), w1p_ref[...],
                    preferred_element_type=jnp.float32)
    # classifier (nonlinear_fc): Linear -> Tanh -> Linear -> Tanh -> Linear
    # TODO(synk): nn.Dropout layers are identity at inference and are omitted.
    h = jnp.tanh(h + b1_ref[...])
    h = jnp.tanh(jnp.dot(h.astype(bf16), w2_ref[...],
                         preferred_element_type=jnp.float32) + b2_ref[...])
    y = jnp.dot(h.astype(bf16), w3_ref[...],
                preferred_element_type=jnp.float32) + b3_ref[...]
    out_ref[...] = y.astype(out_ref.dtype)


def nli_head(u, v, cls_params):
    B, E = u.shape
    (w1, b1), (w2, b2), (w3, b3) = cls_params
    n_classes = w3.shape[0]

    # PyTorch Linear weights are (out, in); pass (in, out) and keep them bf16 (the head
    # is weight-bandwidth bound at real sizes); accumulation stays f32 in the kernel.
    w1t = jnp.transpose(w1).astype(jnp.bfloat16)              # (4*E, fc_dim)
    w1_blocks = [w1t[g * E:(g + 1) * E] for g in range(4)]    # u, v, |u-v|, u*v blocks
    args = [u, v, *w1_blocks,
            b1.reshape(1, -1).astype(jnp.float32),
            jnp.transpose(w2).astype(jnp.bfloat16), b2.reshape(1, -1).astype(jnp.float32),
            jnp.transpose(w3).astype(jnp.bfloat16), b3.reshape(1, -1).astype(jnp.float32)]

    in_specs = [pl.BlockSpec(a.shape, lambda i: (0, 0)) for a in args]
    # TODO(synk): at real sizes (inputdim = 65536, w1 = 64 MiB bf16) tile the feature
    # (K) axis as a grid dimension with an f32 accumulator scratch + pl.when
    # init/finalize so w1 streams from HBM instead of being VMEM-resident, and mark the
    # constant-index specs pipeline_mode=pl.Buffered(1).
    return pl.pallas_call(
        _nli_head_kernel,
        out_shape=jax.ShapeDtypeStruct((B, n_classes), jnp.float32),
        grid_spec=pltpu.PrefetchScalarGridSpec(
            num_scalar_prefetch=0,
            grid=(1,),
            in_specs=in_specs,
            out_specs=pl.BlockSpec((B, n_classes), lambda i: (0, 0)),
        ),
        compiler_params=pltpu.CompilerParams(vmem_limit_bytes=_vmem_limit_bytes()),
    )(*args)


# ------------------------------------- NLINet --------------------------------------

def nli_net_forward(s1, s2, conv_params, cls_params):
    """s1, s2: (L, B, D) f32 -> logits (B, n_classes)."""
    L, B, D = s1.shape
    # Stack both sentences along batch so the encoder runs once with twice the M-dim.
    stacked = jnp.transpose(jnp.concatenate([s1, s2], axis=1), (1, 0, 2))   # (2B, L, D)
    emb = convnet_encoder(stacked, conv_params)                             # (2B, 4*C2)
    u, v = emb[:B], emb[B:]
    return nli_head(u, v, cls_params)


# ---------------------------------- reference / init -------------------------------

def _reference(s1, s2, conv_params, cls_params):
    """Pure-JAX f32 reference mirroring the PyTorch forward."""
    def encode(sent):
        x = jnp.transpose(sent, (1, 2, 0))                                  # (B, D, L)
        us = []
        for w, b in conv_params:
            y = lax.conv_general_dilated(
                x, w, window_strides=(1,), padding=[(1, 1)],
                dimension_numbers=("NCH", "OIH", "NCH"))
            y = jnp.maximum(y + b[None, :, None], 0.0)
            us.append(jnp.max(y, axis=2))
            x = y
        return jnp.concatenate(us, axis=1)

    u, v = encode(s1), encode(s2)
    h = jnp.concatenate([u, v, jnp.abs(u - v), u * v], axis=1)
    (w1, b1), (w2, b2), (w3, b3) = cls_params
    h = jnp.tanh(h @ w1.T + b1)
    h = jnp.tanh(h @ w2.T + b2)
    return h @ w3.T + b3


def _init_conv_params(key, word_emb_dim, enc_lstm_dim):
    """Synthetic Conv1d weights, PyTorch layout (Cout, Cin, K=3)."""
    c2 = 2 * enc_lstm_dim
    dims = [(c2, word_emb_dim), (c2, c2), (c2, c2), (c2, c2)]
    params = []
    for i, (co, ci) in enumerate(dims):
        kw, kb = jax.random.split(jax.random.fold_in(key, i))
        scale = 1.0 / jnp.sqrt(ci * 3.0)
        w = jax.random.uniform(kw, (co, ci, 3), jnp.float32, -scale, scale)
        b = jax.random.uniform(kb, (co,), jnp.float32, -scale, scale)
        params.append((w, b))
    return params


def _init_linear_params(key, dims):
    """Synthetic nn.Linear weights, PyTorch layout (out, in)."""
    params = []
    for i, (din, dout) in enumerate(zip(dims[:-1], dims[1:])):
        kw, kb = jax.random.split(jax.random.fold_in(key, 100 + i))
        scale = 1.0 / jnp.sqrt(float(din))
        w = jax.random.uniform(kw, (dout, din), jnp.float32, -scale, scale)
        b = jax.random.uniform(kb, (dout,), jnp.float32, -scale, scale)
        params.append((w, b))
    return params


if __name__ == "__main__":
    # Small config: bsize=2, word_emb_dim=32, enc_lstm_dim=16, seq_len=8,
    # fc_dim=64, n_classes=3, nonlinear_fc=True (dropout = identity at inference).
    key = jax.random.PRNGKey(0)
    L, B, D, H = 8, 2, 32, 16
    FC_DIM, N_CLASSES = 64, 3

    k1, k2, k3, k4 = jax.random.split(key, 4)
    s1 = jax.random.normal(k1, (L, B, D), jnp.float32)   # (seq, batch, word_emb)
    s2 = jax.random.normal(k2, (L, B, D), jnp.float32)
    conv_params = _init_conv_params(k3, D, H)
    inputdim = 4 * 4 * 2 * H                             # NLINet inputdim for ConvNetEncoder
    cls_params = _init_linear_params(k4, [inputdim, FC_DIM, FC_DIM, N_CLASSES])

    out = jax.block_until_ready(
        jax.jit(nli_net_forward)(s1, s2, conv_params, cls_params))
    ref = jax.block_until_ready(_reference(s1, s2, conv_params, cls_params))

    assert out.shape == (B, N_CLASSES)
    # bf16 conv + classifier weight/operand path (f32 accumulation) vs f32 reference
    # -> slightly loosened tolerance.
    assert jnp.allclose(out, ref, atol=4e-2, rtol=4e-2), "mismatch vs reference"

    print("KERNEL_OK")
</pallas_src>

<mosaic_0001>
module attributes {stable_mosaic.version = 11 : i64} {
  func.func @_convnet_encoder_kernel(%arg0: i32, %arg1: memref<32x32xbf16, #tpu.memory_space<vmem>>, %arg2: memref<32x32xbf16, #tpu.memory_space<vmem>>, %arg3: memref<32x32xbf16, #tpu.memory_space<vmem>>, %arg4: memref<32x32xbf16, #tpu.memory_space<vmem>>, %arg5: memref<1x32xf32, #tpu.memory_space<vmem>>, %arg6: memref<32x32xbf16, #tpu.memory_space<vmem>>, %arg7: memref<32x32xbf16, #tpu.memory_space<vmem>>, %arg8: memref<32x32xbf16, #tpu.memory_space<vmem>>, %arg9: memref<1x32xf32, #tpu.memory_space<vmem>>, %arg10: memref<32x32xbf16, #tpu.memory_space<vmem>>, %arg11: memref<32x32xbf16, #tpu.memory_space<vmem>>, %arg12: memref<32x32xbf16, #tpu.memory_space<vmem>>, %arg13: memref<1x32xf32, #tpu.memory_space<vmem>>, %arg14: memref<32x32xbf16, #tpu.memory_space<vmem>>, %arg15: memref<32x32xbf16, #tpu.memory_space<vmem>>, %arg16: memref<32x32xbf16, #tpu.memory_space<vmem>>, %arg17: memref<1x32xf32, #tpu.memory_space<vmem>>, %arg18: memref<4x128xf32, #tpu.memory_space<vmem>>) attributes {dimension_semantics = [#tpu.dimension_semantics<parallel>], iteration_bounds = array<i64: 1>, scalar_prefetch = 0 : i64, scratch_operands = 0 : i64, tpu.core_type = #tpu.core_type<tc>, window_params = [{transform_indices = @transform_0, window_bounds = array<i64: 32, 32>}, {pipeline_mode = #tpu.pipeline_mode<synchronous>, transform_indices = @transform_1, window_bounds = array<i64: 32, 32>}, {pipeline_mode = #tpu.pipeline_mode<synchronous>, transform_indices = @transform_2, window_bounds = array<i64: 32, 32>}, {pipeline_mode = #tpu.pipeline_mode<synchronous>, transform_indices = @transform_3, window_bounds = array<i64: 32, 32>}, {pipeline_mode = #tpu.pipeline_mode<synchronous>, transform_indices = @transform_4, window_bounds = array<i64: 1, 32>}, {pipeline_mode = #tpu.pipeline_mode<synchronous>, transform_indices = @transform_5, window_bounds = array<i64: 32, 32>}, {pipeline_mode = #tpu.pipeline_mode<synchronous>, transform_indices = @transform_6, window_bounds = array<i64: 32, 32>}, {pipeline_mode = #tpu.pipeline_mode<synchronous>, transform_indices = @transform_7, window_bounds = array<i64: 32, 32>}, {pipeline_mode = #tpu.pipeline_mode<synchronous>, transform_indices = @transform_8, window_bounds = array<i64: 1, 32>}, {pipeline_mode = #tpu.pipeline_mode<synchronous>, transform_indices = @transform_9, window_bounds = array<i64: 32, 32>}, {pipeline_mode = #tpu.pipeline_mode<synchronous>, transform_indices = @transform_10, window_bounds = array<i64: 32, 32>}, {pipeline_mode = #tpu.pipeline_mode<synchronous>, transform_indices = @transform_11, window_bounds = array<i64: 32, 32>}, {pipeline_mode = #tpu.pipeline_mode<synchronous>, transform_indices = @transform_12, window_bounds = array<i64: 1, 32>}, {pipeline_mode = #tpu.pipeline_mode<synchronous>, transform_indices = @transform_13, window_bounds = array<i64: 32, 32>}, {pipeline_mode = #tpu.pipeline_mode<synchronous>, transform_indices = @transform_14, window_bounds = array<i64: 32, 32>}, {pipeline_mode = #tpu.pipeline_mode<synchronous>, transform_indices = @transform_15, window_bounds = array<i64: 32, 32>}, {pipeline_mode = #tpu.pipeline_mode<synchronous>, transform_indices = @transform_16, window_bounds = array<i64: 1, 32>}, {transform_indices = @transform_17, window_bounds = array<i64: 4, 128>}]} {
    %0 = tpu.iota {dimensions = array<i32: 0>} : vector<32x1xi32>
    %c8_i32 = arith.constant 8 : i32
    %c0_i32 = arith.constant 0 : i32
    %1 = arith.cmpi eq, %c8_i32, %c0_i32 : i32
    %c1_i32 = arith.constant 1 : i32
    %2 = arith.select %1, %c1_i32, %c8_i32 : i32
    %3 = vector.broadcast %2 : i32 to vector<32x1xi32>
    %4 = arith.remsi %0, %3 : vector<32x1xi32>
    %c0_i32_0 = arith.constant 0 : i32
    %5 = vector.broadcast %c0_i32_0 : i32 to vector<32x1xi32>
    %6 = arith.cmpi ne, %4, %5 : vector<32x1xi32>
    %c0_i32_1 = arith.constant 0 : i32
    %7 = vector.broadcast %c0_i32_1 : i32 to vector<32x1xi32>
    %8 = arith.cmpi slt, %4, %7 : vector<32x1xi32>
    %c0_i32_2 = arith.constant 0 : i32
    %9 = arith.cmpi slt, %2, %c0_i32_2 : i32
    %10 = vector.broadcast %9 : i1 to vector<32x1xi1>
    %11 = vector.broadcast %10 : vector<32x1xi1> to vector<32x1xi1>
    %12 = arith.xori %8, %11 : vector<32x1xi1>
    %13 = arith.andi %12, %6 : vector<32x1xi1>
    %14 = vector.broadcast %2 : i32 to vector<32x1xi32>
    %15 = arith.addi %4, %14 : vector<32x1xi32>
    %16 = arith.select %13, %15, %4 : vector<32x1xi1>, vector<32x1xi32>
    %c0_i32_3 = arith.constant 0 : i32
    %17 = vector.broadcast %c0_i32_3 : i32 to vector<32x1xi32>
    %18 = arith.cmpi eq, %16, %17 : vector<32x1xi32>
    %c7_i32 = arith.constant 7 : i32
    %19 = vector.broadcast %c7_i32 : i32 to vector<32x1xi32>
    %20 = arith.cmpi eq, %16, %19 : vector<32x1xi32>
    %c0 = arith.constant 0 : index
    %c0_4 = arith.constant 0 : index
    %21 = vector.load %arg1[%c0, %c0_4] : memref<32x32xbf16, #tpu.memory_space<vmem>>, vector<32x32xbf16>
    %c0_5 = arith.constant 0 : index
    %c0_6 = arith.constant 0 : index
    %22 = vector.load %arg3[%c0_5, %c0_6] : memref<32x32xbf16, #tpu.memory_space<vmem>>, vector<32x32xbf16>
    %cst = arith.constant dense<0.000000e+00> : vector<32x32xf32>
    %23 = tpu.matmul %21, %22, %cst {dimension_numbers = #tpu.dot_dimension_numbers<[1], [0], [0], [1], [0, 0, 1, 1], [], []>} : vector<32x32xbf16>, vector<32x32xbf16>, vector<32x32xf32> -> vector<32x32xf32>
    %c0_7 = arith.constant 0 : index
    %c0_8 = arith.constant 0 : index
    %24 = vector.load %arg2[%c0_7, %c0_8] : memref<32x32xbf16, #tpu.memory_space<vmem>>, vector<32x32xbf16>
    %cst_9 = arith.constant dense<0.000000e+00> : vector<32x32xf32>
    %25 = tpu.matmul %21, %24, %cst_9 {dimension_numbers = #tpu.dot_dimension_numbers<[1], [0], [0], [1], [0, 0, 1, 1], [], []>} : vector<32x32xbf16>, vector<32x32xbf16>, vector<32x32xf32> -> vector<32x32xf32>
    %c0_10 = arith.constant 0 : index
    %c0_11 = arith.constant 0 : index
    %26 = vector.load %arg4[%c0_10, %c0_11] : memref<32x32xbf16, #tpu.memory_space<vmem>>, vector<32x32xbf16>
    %cst_12 = arith.constant dense<0.000000e+00> : vector<32x32xf32>
    %27 = tpu.matmul %21, %26, %cst_12 {dimension_numbers = #tpu.dot_dimension_numbers<[1], [0], [0], [1], [0, 0, 1, 1], [], []>} : vector<32x32xbf16>, vector<32x32xbf16>, vector<32x32xf32> -> vector<32x32xf32>
    %c1_i32_13 = arith.constant 1 : i32
    %28 = tpu.dynamic_rotate %25 by %c1_i32_13 dim 0 : vector<32x32xf32>, i32 -> vector<32x32xf32>
    %cst_14 = arith.constant 0.000000e+00 : f32
    %29 = vector.shape_cast %18 : vector<32x1xi1> to vector<32x1xi1>
    %30 = vector.broadcast %29 : vector<32x1xi1> to vector<32x32xi1>
    %31 = vector.broadcast %cst_14 : f32 to vector<32x32xf32>
    %32 = arith.select %30, %31, %28 : vector<32x32xi1>, vector<32x32xf32>
    %33 = arith.addf %23, %32 : vector<32x32xf32>
    %c31_i32 = arith.constant 31 : i32
    %34 = tpu.dynamic_rotate %27 by %c31_i32 dim 0 : vector<32x32xf32>, i32 -> vector<32x32xf32>
    %cst_15 = arith.constant 0.000000e+00 : f32
    %35 = vector.shape_cast %20 : vector<32x1xi1> to vector<32x1xi1>
    %36 = vector.broadcast %35 : vector<32x1xi1> to vector<32x32xi1>
    %37 = vector.broadcast %cst_15 : f32 to vector<32x32xf32>
    %38 = arith.select %36, %37, %34 : vector<32x32xi1>, vector<32x32xf32>
    %39 = arith.addf %33, %38 : vector<32x32xf32>
    %c0_16 = arith.constant 0 : index
    %c0_17 = arith.constant 0 : index
    %40 = vector.load %arg5[%c0_16, %c0_17] : memref<1x32xf32, #tpu.memory_space<vmem>>, vector<1x32xf32>
    %41 = vector.broadcast %40 : vector<1x32xf32> to vector<32x32xf32>
    %42 = arith.addf %39, %41 : vector<32x32xf32>
    %cst_18 = arith.constant 0.000000e+00 : f32
    %43 = vector.broadcast %cst_18 : f32 to vector<32x32xf32>
    %44 = arith.maximumf %42, %43 : vector<32x32xf32>
    %45 = vector.shape_cast %44 : vector<32x32xf32> to vector<4x8x32xf32>
    %cst_19 = arith.constant dense<0xFF800000> : vector<4x32xf32>
    %46 = vector.multi_reduction <maximumf>, %45, %cst_19 [1] : vector<4x8x32xf32> to vector<4x32xf32>
    %c0_20 = arith.constant 0 : index
    %c0_21 = arith.constant 0 : index
    %47 = vector.load %arg18[%c0_20, %c0_21] : memref<4x128xf32, #tpu.memory_space<vmem>>, vector<4x32xf32>
    tpu.vector_store %arg18[%c0_20, %c0_21], %46 {strides = array<i32>} : memref<4x128xf32, #tpu.memory_space<vmem>>, vector<4x32xf32>,
    %48 = arith.truncf %44 : vector<32x32xf32> to vector<32x32xbf16>
    %c0_22 = arith.constant 0 : index
    %c0_23 = arith.constant 0 : index
    %49 = vector.load %arg7[%c0_22, %c0_23] : memref<32x32xbf16, #tpu.memory_space<vmem>>, vector<32x32xbf16>
    %cst_24 = arith.constant dense<0.000000e+00> : vector<32x32xf32>
    %50 = tpu.matmul %48, %49, %cst_24 {dimension_numbers = #tpu.dot_dimension_numbers<[1], [0], [0], [1], [0, 0, 1, 1], [], []>} : vector<32x32xbf16>, vector<32x32xbf16>, vector<32x32xf32> -> vector<32x32xf32>
    %c0_25 = arith.constant 0 : index
    %c0_26 = arith.constant 0 : index
    %51 = vector.load %arg6[%c0_25, %c0_26] : memref<32x32xbf16, #tpu.memory_space<vmem>>, vector<32x32xbf16>
    %cst_27 = arith.constant dense<0.000000e+00> : vector<32x32xf32>
    %52 = tpu.matmul %48, %51, %cst_27 {dimension_numbers = #tpu.dot_dimension_numbers<[1], [0], [0], [1], [0, 0, 1, 1], [], []>} : vector<32x32xbf16>, vector<32x32xbf16>, vector<32x32xf32> -> vector<32x32xf32>
    %c0_28 = arith.constant 0 : index
    %c0_29 = arith.constant 0 : index
    %53 = vector.load %arg8[%c0_28, %c0_29] : memref<32x32xbf16, #tpu.memory_space<vmem>>, vector<32x32xbf16>
    %cst_30 = arith.constant dense<0.000000e+00> : vector<32x32xf32>
    %54 = tpu.matmul %48, %53, %cst_30 {dimension_numbers = #tpu.dot_dimension_numbers<[1], [0], [0], [1], [0, 0, 1, 1], [], []>} : vector<32x32xbf16>, vector<32x32xbf16>, vector<32x32xf32> -> vector<32x32xf32>
    %c1_i32_31 = arith.constant 1 : i32
    %55 = tpu.dynamic_rotate %52 by %c1_i32_31 dim 0 : vector<32x32xf32>, i32 -> vector<32x32xf32>
    %cst_32 = arith.constant 0.000000e+00 : f32
    %56 = vector.shape_cast %18 : vector<32x1xi1> to vector<32x1xi1>
    %57 = vector.broadcast %56 : vector<32x1xi1> to vector<32x32xi1>
    %58 = vector.broadcast %cst_32 : f32 to vector<32x32xf32>
    %59 = arith.select %57, %58, %55 : vector<32x32xi1>, vector<32x32xf32>
    %60 = arith.addf %50, %59 : vector<32x32xf32>
    %c31_i32_33 = arith.constant 31 : i32
    %61 = tpu.dynamic_rotate %54 by %c31_i32_33 dim 0 : vector<32x32xf32>, i32 -> vector<32x32xf32>
    %cst_34 = arith.constant 0.000000e+00 : f32
    %62 = vector.shape_cast %20 : vector<32x1xi1> to vector<32x1xi1>
    %63 = vector.broadcast %62 : vector<32x1xi1> to vector<32x32xi1>
    %64 = vector.broadcast %cst_34 : f32 to vector<32x32xf32>
    %65 = arith.select %63, %64, %61 : vector<32x32xi1>, vector<32x32xf32>
    %66 = arith.addf %60, %65 : vector<32x32xf32>
    %c0_35 = arith.constant 0 : index
    %c0_36 = arith.constant 0 : index
    %67 = vector.load %arg9[%c0_35, %c0_36] : memref<1x32xf32, #tpu.memory_space<vmem>>, vector<1x32xf32>
    %68 = vector.broadcast %67 : vector<1x32xf32> to vector<32x32xf32>
    %69 = arith.addf %66, %68 : vector<32x32xf32>
    %cst_37 = arith.constant 0.000000e+00 : f32
    %70 = vector.broadcast %cst_37 : f32 to vector<32x32xf32>
    %71 = arith.maximumf %69, %70 : vector<32x32xf32>
    %72 = vector.shape_cast %71 : vector<32x32xf32> to vector<4x8x32xf32>
    %cst_38 = arith.constant dense<0xFF800000> : vector<4x32xf32>
    %73 = vector.multi_reduction <maximumf>, %72, %cst_38 [1] : vector<4x8x32xf32> to vector<4x32xf32>
    %c0_39 = arith.constant 0 : index
    %c32 = arith.constant 32 : index
    %74 = vector.load %arg18[%c0_39, %c32] : memref<4x128xf32, #tpu.memory_space<vmem>>, vector<4x32xf32>
    tpu.vector_store %arg18[%c0_39, %c32], %73 {strides = array<i32>} : memref<4x128xf32, #tpu.memory_space<vmem>>, vector<4x32xf32>,
    %75 = arith.truncf %71 : vector<32x32xf32> to vector<32x32xbf16>
    %c0_40 = arith.constant 0 : index
    %c0_41 = arith.constant 0 : index
    %76 = vector.load %arg11[%c0_40, %c0_41] : memref<32x32xbf16, #tpu.memory_space<vmem>>, vector<32x32xbf16>
    %cst_42 = arith.constant dense<0.000000e+00> : vector<32x32xf32>
    %77 = tpu.matmul %75, %76, %cst_42 {dimension_numbers = #tpu.dot_dimension_numbers<[1], [0], [0], [1], [0, 0, 1, 1], [], []>} : vector<32x32xbf16>, vector<32x32xbf16>, vector<32x32xf32> -> vector<32x32xf32>
    %c0_43 = arith.constant 0 : index
    %c0_44 = arith.constant 0 : index
    %78 = vector.load %arg10[%c0_43, %c0_44] : memref<32x32xbf16, #tpu.memory_space<vmem>>, vector<32x32xbf16>
    %cst_45 = arith.constant dense<0.000000e+00> : vector<32x32xf32>
    %79 = tpu.matmul %75, %78, %cst_45 {dimension_numbers = #tpu.dot_dimension_numbers<[1], [0], [0], [1], [0, 0, 1, 1], [], []>} : vector<32x32xbf16>, vector<32x32xbf16>, vector<32x32xf32> -> vector<32x32xf32>
    %c0_46 = arith.constant 0 : index
    %c0_47 = arith.constant 0 : index
    %80 = vector.load %arg12[%c0_46, %c0_47] : memref<32x32xbf16, #tpu.memory_space<vmem>>, vector<32x32xbf16>
    %cst_48 = arith.constant dense<0.000000e+00> : vector<32x32xf32>
    %81 = tpu.matmul %75, %80, %cst_48 {dimension_numbers = #tpu.dot_dimension_numbers<[1], [0], [0], [1], [0, 0, 1, 1], [], []>} : vector<32x32xbf16>, vector<32x32xbf16>, vector<32x32xf32> -> vector<32x32xf32>
    %c1_i32_49 = arith.constant 1 : i32
    %82 = tpu.dynamic_rotate %79 by %c1_i32_49 dim 0 : vector<32x32xf32>, i32 -> vector<32x32xf32>
    %cst_50 = arith.constant 0.000000e+00 : f32
    %83 = vector.shape_cast %18 : vector<32x1xi1> to vector<32x1xi1>
    %84 = vector.broadcast %83 : vector<32x1xi1> to vector<32x32xi1>
    %85 = vector.broadcast %cst_50 : f32 to vector<32x32xf32>
    %86 = arith.select %84, %85, %82 : vector<32x32xi1>, vector<32x32xf32>
    %87 = arith.addf %77, %86 : vector<32x32xf32>
    %c31_i32_51 = arith.constant 31 : i32
    %88 = tpu.dynamic_rotate %81 by %c31_i32_51 dim 0 : vector<32x32xf32>, i32 -> vector<32x32xf32>
    %cst_52 = arith.constant 0.000000e+00 : f32
    %89 = vector.shape_cast %20 : vector<32x1xi1> to vector<32x1xi1>
    %90 = vector.broadcast %89 : vector<32x1xi1> to vector<32x32xi1>
    %91 = vector.broadcast %cst_52 : f32 to vector<32x32xf32>
    %92 = arith.select %90, %91, %88 : vector<32x32xi1>, vector<32x32xf32>
    %93 = arith.addf %87, %92 : vector<32x32xf32>
    %c0_53 = arith.constant 0 : index
    %c0_54 = arith.constant 0 : index
    %94 = vector.load %arg13[%c0_53, %c0_54] : memref<1x32xf32, #tpu.memory_space<vmem>>, vector<1x32xf32>
    %95 = vector.broadcast %94 : vector<1x32xf32> to vector<32x32xf32>
    %96 = arith.addf %93, %95 : vector<32x32xf32>
    %cst_55 = arith.constant 0.000000e+00 : f32
    %97 = vector.broadcast %cst_55 : f32 to vector<32x32xf32>
    %98 = arith.maximumf %96, %97 : vector<32x32xf32>
    %99 = vector.shape_cast %98 : vector<32x32xf32> to vector<4x8x32xf32>
    %cst_56 = arith.constant dense<0xFF800000> : vector<4x32xf32>
    %100 = vector.multi_reduction <maximumf>, %99, %cst_56 [1] : vector<4x8x32xf32> to vector<4x32xf32>
    %c0_57 = arith.constant 0 : index
    %c64 = arith.constant 64 : index
    %101 = vector.load %arg18[%c0_57, %c64] : memref<4x128xf32, #tpu.memory_space<vmem>>, vector<4x32xf32>
    tpu.vector_store %arg18[%c0_57, %c64], %100 {strides = array<i32>} : memref<4x128xf32, #tpu.memory_space<vmem>>, vector<4x32xf32>,
    %102 = arith.truncf %98 : vector<32x32xf32> to vector<32x32xbf16>
    %c0_58 = arith.constant 0 : index
    %c0_59 = arith.constant 0 : index
    %103 = vector.load %arg15[%c0_58, %c0_59] : memref<32x32xbf16, #tpu.memory_space<vmem>>, vector<32x32xbf16>
    %cst_60 = arith.constant dense<0.000000e+00> : vector<32x32xf32>
    %104 = tpu.matmul %102, %103, %cst_60 {dimension_numbers = #tpu.dot_dimension_numbers<[1], [0], [0], [1], [0, 0, 1, 1], [], []>} : vector<32x32xbf16>, vector<32x32xbf16>, vector<32x32xf32> -> vector<32x32xf32>
    %c0_61 = arith.constant 0 : index
    %c0_62 = arith.constant 0 : index
    %105 = vector.load %arg14[%c0_61, %c0_62] : memref<32x32xbf16, #tpu.memory_space<vmem>>, vector<32x32xbf16>
    %cst_63 = arith.constant dense<0.000000e+00> : vector<32x32xf32>
    %106 = tpu.matmul %102, %105, %cst_63 {dimension_numbers = #tpu.dot_dimension_numbers<[1], [0], [0], [1], [0, 0, 1, 1], [], []>} : vector<32x32xbf16>, vector<32x32xbf16>, vector<32x32xf32> -> vector<32x32xf32>
    %c0_64 = arith.constant 0 : index
    %c0_65 = arith.constant 0 : index
    %107 = vector.load %arg16[%c0_64, %c0_65] : memref<32x32xbf16, #tpu.memory_space<vmem>>, vector<32x32xbf16>
    %cst_66 = arith.constant dense<0.000000e+00> : vector<32x32xf32>
    %108 = tpu.matmul %102, %107, %cst_66 {dimension_numbers = #tpu.dot_dimension_numbers<[1], [0], [0], [1], [0, 0, 1, 1], [], []>} : vector<32x32xbf16>, vector<32x32xbf16>, vector<32x32xf32> -> vector<32x32xf32>
    %c1_i32_67 = arith.constant 1 : i32
    %109 = tpu.dynamic_rotate %106 by %c1_i32_67 dim 0 : vector<32x32xf32>, i32 -> vector<32x32xf32>
    %cst_68 = arith.constant 0.000000e+00 : f32
    %110 = vector.shape_cast %18 : vector<32x1xi1> to vector<32x1xi1>
    %111 = vector.broadcast %110 : vector<32x1xi1> to vector<32x32xi1>
    %112 = vector.broadcast %cst_68 : f32 to vector<32x32xf32>
    %113 = arith.select %111, %112, %109 : vector<32x32xi1>, vector<32x32xf32>
    %114 = arith.addf %104, %113 : vector<32x32xf32>
    %c31_i32_69 = arith.constant 31 : i32
    %115 = tpu.dynamic_rotate %108 by %c31_i32_69 dim 0 : vector<32x32xf32>, i32 -> vector<32x32xf32>
    %cst_70 = arith.constant 0.000000e+00 : f32
    %116 = vector.shape_cast %20 : vector<32x1xi1> to vector<32x1xi1>
    %117 = vector.broadcast %116 : vector<32x1xi1> to vector<32x32xi1>
    %118 = vector.broadcast %cst_70 : f32 to vector<32x32xf32>
    %119 = arith.select %117, %118, %115 : vector<32x32xi1>, vector<32x32xf32>
    %120 = arith.addf %114, %119 : vector<32x32xf32>
    %c0_71 = arith.constant 0 : index
    %c0_72 = arith.constant 0 : index
    %121 = vector.load %arg17[%c0_71, %c0_72] : memref<1x32xf32, #tpu.memory_space<vmem>>, vector<1x32xf32>
    %122 = vector.broadcast %121 : vector<1x32xf32> to vector<32x32xf32>
    %123 = arith.addf %120, %122 : vector<32x32xf32>
    %cst_73 = arith.constant 0.000000e+00 : f32
    %124 = vector.broadcast %cst_73 : f32 to vector<32x32xf32>
    %125 = arith.maximumf %123, %124 : vector<32x32xf32>
    %126 = vector.shape_cast %125 : vector<32x32xf32> to vector<4x8x32xf32>
    %cst_74 = arith.constant dense<0xFF800000> : vector<4x32xf32>
    %127 = vector.multi_reduction <maximumf>, %126, %cst_74 [1] : vector<4x8x32xf32> to vector<4x32xf32>
    %c0_75 = arith.constant 0 : index
    %c96 = arith.constant 96 : index
    %128 = vector.load %arg18[%c0_75, %c96] : memref<4x128xf32, #tpu.memory_space<vmem>>, vector<4x32xf32>
    tpu.vector_store %arg18[%c0_75, %c96], %127 {strides = array<i32>} : memref<4x128xf32, #tpu.memory_space<vmem>>, vector<4x32xf32>,
    return
  }
  func.func @transform_0(%arg0: i32) -> (i32, i32) {
    %c0_i32 = arith.constant 0 : i32
    %c0_i32_0 = arith.constant 0 : i32
    return %arg0, %c0_i32 : i32, i32
  }
  func.func @transform_1(%arg0: i32) -> (i32, i32) {
    %c0_i32 = arith.constant 0 : i32
    %c0_i32_0 = arith.constant 0 : i32
    %c0_i32_1 = arith.constant 0 : i32
    return %c0_i32, %c0_i32_0 : i32, i32
  }
  func.func @transform_2(%arg0: i32) -> (i32, i32) {
    %c0_i32 = arith.constant 0 : i32
    %c0_i32_0 = arith.constant 0 : i32
    %c0_i32_1 = arith.constant 0 : i32
    return %c0_i32, %c0_i32_0 : i32, i32
  }
  func.func @transform_3(%arg0: i32) -> (i32, i32) {
    %c0_i32 = arith.constant 0 : i32
    %c0_i32_0 = arith.constant 0 : i32
    %c0_i32_1 = arith.constant 0 : i32
    return %c0_i32, %c0_i32_0 : i32, i32
  }
  func.func @transform_4(%arg0: i32) -> (i32, i32) {
    %c0_i32 = arith.constant 0 : i32
    %c0_i32_0 = arith.constant 0 : i32
    %c0_i32_1 = arith.constant 0 : i32
    return %c0_i32, %c0_i32_0 : i32, i32
  }
  func.func @transform_5(%arg0: i32) -> (i32, i32) {
    %c0_i32 = arith.constant 0 : i32
    %c0_i32_0 = arith.constant 0 : i32
    %c0_i32_1 = arith.constant 0 : i32
    return %c0_i32, %c0_i32_0 : i32, i32
  }
  func.func @transform_6(%arg0: i32) -> (i32, i32) {
    %c0_i32 = arith.constant 0 : i32
    %c0_i32_0 = arith.constant 0 : i32
    %c0_i32_1 = arith.constant 0 : i32
    return %c0_i32, %c0_i32_0 : i32, i32
  }
  func.func @transform_7(%arg0: i32) -> (i32, i32) {
    %c0_i32 = arith.constant 0 : i32
    %c0_i32_0 = arith.constant 0 : i32
    %c0_i32_1 = arith.constant 0 : i32
    return %c0_i32, %c0_i32_0 : i32, i32
  }
  func.func @transform_8(%arg0: i32) -> (i32, i32) {
    %c0_i32 = arith.constant 0 : i32
    %c0_i32_0 = arith.constant 0 : i32
    %c0_i32_1 = arith.constant 0 : i32
    return %c0_i32, %c0_i32_0 : i32, i32
  }
  func.func @transform_9(%arg0: i32) -> (i32, i32) {
    %c0_i32 = arith.constant 0 : i32
    %c0_i32_0 = arith.constant 0 : i32
    %c0_i32_1 = arith.constant 0 : i32
    return %c0_i32, %c0_i32_0 : i32, i32
  }
  func.func @transform_10(%arg0: i32) -> (i32, i32) {
    %c0_i32 = arith.constant 0 : i32
    %c0_i32_0 = arith.constant 0 : i32
    %c0_i32_1 = arith.constant 0 : i32
    return %c0_i32, %c0_i32_0 : i32, i32
  }
  func.func @transform_11(%arg0: i32) -> (i32, i32) {
    %c0_i32 = arith.constant 0 : i32
    %c0_i32_0 = arith.constant 0 : i32
    %c0_i32_1 = arith.constant 0 : i32
    return %c0_i32, %c0_i32_0 : i32, i32
  }
  func.func @transform_12(%arg0: i32) -> (i32, i32) {
    %c0_i32 = arith.constant 0 : i32
    %c0_i32_0 = arith.constant 0 : i32
    %c0_i32_1 = arith.constant 0 : i32
    return %c0_i32, %c0_i32_0 : i32, i32
  }
  func.func @transform_13(%arg0: i32) -> (i32, i32) {
    %c0_i32 = arith.constant 0 : i32
    %c0_i32_0 = arith.constant 0 : i32
    %c0_i32_1 = arith.constant 0 : i32
    return %c0_i32, %c0_i32_0 : i32, i32
  }
  func.func @transform_14(%arg0: i32) -> (i32, i32) {
    %c0_i32 = arith.constant 0 : i32
    %c0_i32_0 = arith.constant 0 : i32
    %c0_i32_1 = arith.constant 0 : i32
    return %c0_i32, %c0_i32_0 : i32, i32
  }
  func.func @transform_15(%arg0: i32) -> (i32, i32) {
    %c0_i32 = arith.constant 0 : i32
    %c0_i32_0 = arith.constant 0 : i32
    %c0_i32_1 = arith.constant 0 : i32
    return %c0_i32, %c0_i32_0 : i32, i32
  }
  func.func @transform_16(%arg0: i32) -> (i32, i32) {
    %c0_i32 = arith.constant 0 : i32
    %c0_i32_0 = arith.constant 0 : i32
    %c0_i32_1 = arith.constant 0 : i32
    return %c0_i32, %c0_i32_0 : i32, i32
  }
  func.func @transform_17(%arg0: i32) -> (i32, i32) {
    %c0_i32 = arith.constant 0 : i32
    %c0_i32_0 = arith.constant 0 : i32
    return %arg0, %c0_i32 : i32, i32
  }
}

module attributes {stable_mosaic.version = 11 : i64} {
  func.func @_nli_head_kernel(%arg0: i32, %arg1: memref<2x128xf32, #tpu.memory_space<vmem>>, %arg2: memref<2x128xf32, #tpu.memory_space<vmem>>, %arg3: memref<128x64xbf16, #tpu.memory_space<vmem>>, %arg4: memref<128x64xbf16, #tpu.memory_space<vmem>>, %arg5: memref<128x64xbf16, #tpu.memory_space<vmem>>, %arg6: memref<128x64xbf16, #tpu.memory_space<vmem>>, %arg7: memref<1x64xf32, #tpu.memory_space<vmem>>, %arg8: memref<64x64xbf16, #tpu.memory_space<vmem>>, %arg9: memref<1x64xf32, #tpu.memory_space<vmem>>, %arg10: memref<64x3xbf16, #tpu.memory_space<vmem>>, %arg11: memref<1x3xf32, #tpu.memory_space<vmem>>, %arg12: memref<2x3xf32, #tpu.memory_space<vmem>>) attributes {dimension_semantics = [#tpu.dimension_semantics<arbitrary>], iteration_bounds = array<i64: 1>, scalar_prefetch = 0 : i64, scratch_operands = 0 : i64, tpu.core_type = #tpu.core_type<tc>, window_params = [{pipeline_mode = #tpu.pipeline_mode<synchronous>, transform_indices = @transform_0, window_bounds = array<i64: 2, 128>}, {pipeline_mode = #tpu.pipeline_mode<synchronous>, transform_indices = @transform_1, window_bounds = array<i64: 2, 128>}, {pipeline_mode = #tpu.pipeline_mode<synchronous>, transform_indices = @transform_2, window_bounds = array<i64: 128, 64>}, {pipeline_mode = #tpu.pipeline_mode<synchronous>, transform_indices = @transform_3, window_bounds = array<i64: 128, 64>}, {pipeline_mode = #tpu.pipeline_mode<synchronous>, transform_indices = @transform_4, window_bounds = array<i64: 128, 64>}, {pipeline_mode = #tpu.pipeline_mode<synchronous>, transform_indices = @transform_5, window_bounds = array<i64: 128, 64>}, {pipeline_mode = #tpu.pipeline_mode<synchronous>, transform_indices = @transform_6, window_bounds = array<i64: 1, 64>}, {pipeline_mode = #tpu.pipeline_mode<synchronous>, transform_indices = @transform_7, window_bounds = array<i64: 64, 64>}, {pipeline_mode = #tpu.pipeline_mode<synchronous>, transform_indices = @transform_8, window_bounds = array<i64: 1, 64>}, {pipeline_mode = #tpu.pipeline_mode<synchronous>, transform_indices = @transform_9, window_bounds = array<i64: 64, 3>}, {pipeline_mode = #tpu.pipeline_mode<synchronous>, transform_indices = @transform_10, window_bounds = array<i64: 1, 3>}, {pipeline_mode = #tpu.pipeline_mode<synchronous>, transform_indices = @transform_11, window_bounds = array<i64: 2, 3>}]} {
    %c0 = arith.constant 0 : index
    %c0_0 = arith.constant 0 : index
    %0 = vector.load %arg1[%c0, %c0_0] : memref<2x128xf32, #tpu.memory_space<vmem>>, vector<2x128xf32>
    %c0_1 = arith.constant 0 : index
    %c0_2 = arith.constant 0 : index
    %1 = vector.load %arg2[%c0_1, %c0_2] : memref<2x128xf32, #tpu.memory_space<vmem>>, vector<2x128xf32>
    %2 = arith.truncf %0 : vector<2x128xf32> to vector<2x128xbf16>
    %c0_3 = arith.constant 0 : index
    %c0_4 = arith.constant 0 : index
    %3 = vector.load %arg3[%c0_3, %c0_4] : memref<128x64xbf16, #tpu.memory_space<vmem>>, vector<128x64xbf16>
    %cst = arith.constant dense<0.000000e+00> : vector<2x64xf32>
    %4 = tpu.matmul %2, %3, %cst {dimension_numbers = #tpu.dot_dimension_numbers<[1], [0], [0], [1], [0, 0, 1, 1], [], []>} : vector<2x128xbf16>, vector<128x64xbf16>, vector<2x64xf32> -> vector<2x64xf32>
    %5 = arith.truncf %1 : vector<2x128xf32> to vector<2x128xbf16>
    %c0_5 = arith.constant 0 : index
    %c0_6 = arith.constant 0 : index
    %6 = vector.load %arg4[%c0_5, %c0_6] : memref<128x64xbf16, #tpu.memory_space<vmem>>, vector<128x64xbf16>
    %cst_7 = arith.constant dense<0.000000e+00> : vector<2x64xf32>
    %7 = tpu.matmul %5, %6, %cst_7 {dimension_numbers = #tpu.dot_dimension_numbers<[1], [0], [0], [1], [0, 0, 1, 1], [], []>} : vector<2x128xbf16>, vector<128x64xbf16>, vector<2x64xf32> -> vector<2x64xf32>
    %8 = arith.addf %4, %7 : vector<2x64xf32>
    %9 = arith.subf %0, %1 : vector<2x128xf32>
    %10 = math.absf %9 : vector<2x128xf32>
    %11 = arith.truncf %10 : vector<2x128xf32> to vector<2x128xbf16>
    %c0_8 = arith.constant 0 : index
    %c0_9 = arith.constant 0 : index
    %12 = vector.load %arg5[%c0_8, %c0_9] : memref<128x64xbf16, #tpu.memory_space<vmem>>, vector<128x64xbf16>
    %cst_10 = arith.constant dense<0.000000e+00> : vector<2x64xf32>
    %13 = tpu.matmul %11, %12, %cst_10 {dimension_numbers = #tpu.dot_dimension_numbers<[1], [0], [0], [1], [0, 0, 1, 1], [], []>} : vector<2x128xbf16>, vector<128x64xbf16>, vector<2x64xf32> -> vector<2x64xf32>
    %14 = arith.addf %8, %13 : vector<2x64xf32>
    %15 = arith.mulf %0, %1 : vector<2x128xf32>
    %16 = arith.truncf %15 : vector<2x128xf32> to vector<2x128xbf16>
    %c0_11 = arith.constant 0 : index
    %c0_12 = arith.constant 0 : index
    %17 = vector.load %arg6[%c0_11, %c0_12] : memref<128x64xbf16, #tpu.memory_space<vmem>>, vector<128x64xbf16>
    %cst_13 = arith.constant dense<0.000000e+00> : vector<2x64xf32>
    %18 = tpu.matmul %16, %17, %cst_13 {dimension_numbers = #tpu.dot_dimension_numbers<[1], [0], [0], [1], [0, 0, 1, 1], [], []>} : vector<2x128xbf16>, vector<128x64xbf16>, vector<2x64xf32> -> vector<2x64xf32>
    %19 = arith.addf %14, %18 : vector<2x64xf32>
    %c0_14 = arith.constant 0 : index
    %c0_15 = arith.constant 0 : index
    %20 = vector.load %arg7[%c0_14, %c0_15] : memref<1x64xf32, #tpu.memory_space<vmem>>, vector<1x64xf32>
    %21 = vector.broadcast %20 : vector<1x64xf32> to vector<2x64xf32>
    %22 = arith.addf %19, %21 : vector<2x64xf32>
    %23 = math.tanh %22 : vector<2x64xf32>
    %24 = arith.truncf %23 : vector<2x64xf32> to vector<2x64xbf16>
    %c0_16 = arith.constant 0 : index
    %c0_17 = arith.constant 0 : index
    %25 = vector.load %arg8[%c0_16, %c0_17] : memref<64x64xbf16, #tpu.memory_space<vmem>>, vector<64x64xbf16>
    %cst_18 = arith.constant dense<0.000000e+00> : vector<2x64xf32>
    %26 = tpu.matmul %24, %25, %cst_18 {dimension_numbers = #tpu.dot_dimension_numbers<[1], [0], [0], [1], [0, 0, 1, 1], [], []>} : vector<2x64xbf16>, vector<64x64xbf16>, vector<2x64xf32> -> vector<2x64xf32>
    %c0_19 = arith.constant 0 : index
    %c0_20 = arith.constant 0 : index
    %27 = vector.load %arg9[%c0_19, %c0_20] : memref<1x64xf32, #tpu.memory_space<vmem>>, vector<1x64xf32>
    %28 = vector.broadcast %27 : vector<1x64xf32> to vector<2x64xf32>
    %29 = arith.addf %26, %28 : vector<2x64xf32>
    %30 = math.tanh %29 : vector<2x64xf32>
    %31 = arith.truncf %30 : vector<2x64xf32> to vector<2x64xbf16>
    %c0_21 = arith.constant 0 : index
    %c0_22 = arith.constant 0 : index
    %32 = vector.load %arg10[%c0_21, %c0_22] : memref<64x3xbf16, #tpu.memory_space<vmem>>, vector<64x3xbf16>
    %cst_23 = arith.constant dense<0.000000e+00> : vector<2x3xf32>
    %33 = tpu.matmul %31, %32, %cst_23 {dimension_numbers = #tpu.dot_dimension_numbers<[1], [0], [0], [1], [0, 0, 1, 1], [], []>} : vector<2x64xbf16>, vector<64x3xbf16>, vector<2x3xf32> -> vector<2x3xf32>
    %c0_24 = arith.constant 0 : index
    %c0_25 = arith.constant 0 : index
    %34 = vector.load %arg11[%c0_24, %c0_25] : memref<1x3xf32, #tpu.memory_space<vmem>>, vector<1x3xf32>
    %35 = vector.broadcast %34 : vector<1x3xf32> to vector<2x3xf32>
    %36 = arith.addf %33, %35 : vector<2x3xf32>
    %c0_26 = arith.constant 0 : index
    %c0_27 = arith.constant 0 : index
    %37 = vector.load %arg12[%c0_26, %c0_27] : memref<2x3xf32, #tpu.memory_space<vmem>>, vector<2x3xf32>
    tpu.vector_store %arg12[%c0_26, %c0_27], %36 {strides = array<i32>} : memref<2x3xf32, #tpu.memory_space<vmem>>, vector<2x3xf32>,
    return
  }
  func.func @transform_0(%arg0: i32) -> (i32, i32) {
    %c0_i32 = arith.constant 0 : i32
    %c0_i32_0 = arith.constant 0 : i32
    %c0_i32_1 = arith.constant 0 : i32
    return %c0_i32, %c0_i32_0 : i32, i32
  }
  func.func @transform_1(%arg0: i32) -> (i32, i32) {
    %c0_i32 = arith.constant 0 : i32
    %c0_i32_0 = arith.constant 0 : i32
    %c0_i32_1 = arith.constant 0 : i32
    return %c0_i32, %c0_i32_0 : i32, i32
  }
  func.func @transform_2(%arg0: i32) -> (i32, i32) {
    %c0_i32 = arith.constant 0 : i32
    %c0_i32_0 = arith.constant 0 : i32
    %c0_i32_1 = arith.constant 0 : i32
    return %c0_i32, %c0_i32_0 : i32, i32
  }
  func.func @transform_3(%arg0: i32) -> (i32, i32) {
    %c0_i32 = arith.constant 0 : i32
    %c0_i32_0 = arith.constant 0 : i32
    %c0_i32_1 = arith.constant 0 : i32
    return %c0_i32, %c0_i32_0 : i32, i32
  }
  func.func @transform_4(%arg0: i32) -> (i32, i32) {
    %c0_i32 = arith.constant 0 : i32
    %c0_i32_0 = arith.constant 0 : i32
    %c0_i32_1 = arith.constant 0 : i32
    return %c0_i32, %c0_i32_0 : i32, i32
  }
  func.func @transform_5(%arg0: i32) -> (i32, i32) {
    %c0_i32 = arith.constant 0 : i32
    %c0_i32_0 = arith.constant 0 : i32
    %c0_i32_1 = arith.constant 0 : i32
    return %c0_i32, %c0_i32_0 : i32, i32
  }
  func.func @transform_6(%arg0: i32) -> (i32, i32) {
    %c0_i32 = arith.constant 0 : i32
    %c0_i32_0 = arith.constant 0 : i32
    %c0_i32_1 = arith.constant 0 : i32
    return %c0_i32, %c0_i32_0 : i32, i32
  }
  func.func @transform_7(%arg0: i32) -> (i32, i32) {
    %c0_i32 = arith.constant 0 : i32
    %c0_i32_0 = arith.constant 0 : i32
    %c0_i32_1 = arith.constant 0 : i32
    return %c0_i32, %c0_i32_0 : i32, i32
  }
  func.func @transform_8(%arg0: i32) -> (i32, i32) {
    %c0_i32 = arith.constant 0 : i32
    %c0_i32_0 = arith.constant 0 : i32
    %c0_i32_1 = arith.constant 0 : i32
    return %c0_i32, %c0_i32_0 : i32, i32
  }
  func.func @transform_9(%arg0: i32) -> (i32, i32) {
    %c0_i32 = arith.constant 0 : i32
    %c0_i32_0 = arith.constant 0 : i32
    %c0_i32_1 = arith.constant 0 : i32
    return %c0_i32, %c0_i32_0 : i32, i32
  }
  func.func @transform_10(%arg0: i32) -> (i32, i32) {
    %c0_i32 = arith.constant 0 : i32
    %c0_i32_0 = arith.constant 0 : i32
    %c0_i32_1 = arith.constant 0 : i32
    return %c0_i32, %c0_i32_0 : i32, i32
  }
  func.func @transform_11(%arg0: i32) -> (i32, i32) {
    %c0_i32 = arith.constant 0 : i32
    %c0_i32_0 = arith.constant 0 : i32
    %c0_i32_1 = arith.constant 0 : i32
    return %c0_i32, %c0_i32_0 : i32, i32
  }
}

</mosaic_0001>

<bundles_post_ra>
// kernel: nli_net_forward.3
= control target key start
LH: loop header
LB: loop body
LE: loop exit
PB: predicated region body
PF: predicated region fallthrough
CT: control target
= control target key end

     0   :  { %v926_v1 = vmov 0.0   ;;  %vm927_vm0 = vmmov 0   ;;  %s1190_s0 = inlined_call_operand.vmem [shape: f32[2,128], index: 0, kind: input, shape index: {}]   ;;  %s1191_s1 = inlined_call_operand.vmem [shape: f32[2,128], index: 1, kind: input, shape index: {}]   ;;  %s1192_s2 = inlined_call_operand.vmem [shape: bf16[128,64], index: 2, kind: input, shape index: {}]   ;;  %s1193_s3 = inlined_call_operand.vmem [shape: bf16[128,64], index: 3, kind: input, shape index: {}]   ;;  %s1194_s4 = inlined_call_operand.vmem [shape: bf16[128,64], index: 4, kind: input, shape index: {}]   ;;  %s1195_s5 = inlined_call_operand.vmem [shape: bf16[128,64], index: 5, kind: input, shape index: {}]   ;;  %s1196_s6 = inlined_call_operand.vmem [shape: f32[1,64], index: 6, kind: input, shape index: {}]   ;;  %s1197_s7 = inlined_call_operand.vmem [shape: bf16[64,64], index: 7, kind: input, shape index: {}]   ;;  %s1198_s8 = inlined_call_operand.vmem [shape: f32[1,64], index: 8, kind: input, shape index: {}]   ;;  %s1199_s9 = inlined_call_operand.vmem [shape: bf16[64,3], index: 9, kind: input, shape index: {}]   ;;  %s1200_s10 = inlined_call_operand.vmem [shape: f32[1,3], index: 10, kind: input, shape index: {}]   ;;  %s1201_s11 = inlined_call_operand.hbm [shape: f32[2,3], index: 11, kind: output, shape index: {}]  }
   0x1   :  { %v858_v0 = vld [vmem:[%s1193_s3] sm:$0xff]   ;;  %751 = vmatprep.subr.bf16.mxu0 %v926_v1  ;;  %771 = vmatprep.subr.bf16.mxu1 %v926_v1  ;;  %v860_v3 = vld [vmem:[%s1193_s3 + $0x8] sm:$0xff]   ;;  %v862_v5 = vld [vmem:[%s1193_s3 + $0x10] sm:$0xff]  }
   0x2   :  { %v859_v2 = vld [vmem:[%s1192_s2] sm:$0xff]   ;;  %752 = vmatpush3.bf16.msra.mxu0 %v858_v0  ;;  %767 = vmatprep.mubr.msk.bf16.mxu0 %vm927_vm0, %v926_v1  ;;  %v861_v4 = vld [vmem:[%s1192_s2 + $0x8] sm:$0xff]   ;;  %v863_v6 = vld [vmem:[%s1192_s2 + $0x10] sm:$0xff]  }
   0x3   :  { %772 = vmatpush3.bf16.msra.mxu1 %v859_v2  ;;  %753 = vmatprep.subr.bf16.mxu0 %v926_v1  ;;  %v864_v7 = vld [vmem:[%s1193_s3 + $0x18] sm:$0xff]   ;;  %v866_v9 = vld [vmem:[%s1193_s3 + $0x20] sm:$0xff]   ;;  %v868_v11 = vld [vmem:[%s1193_s3 + $0x28] sm:$0xff]  }
   0x4   :  { %773 = vmatprep.subr.bf16.mxu1 %v926_v1  ;;  %787 = vmatprep.mubr.msk.bf16.mxu1 %vm927_vm0, %v926_v1  ;;  %v865_v8 = vld [vmem:[%s1192_s2 + $0x18] sm:$0xff]   ;;  %v867_v10 = vld [vmem:[%s1192_s2 + $0x20] sm:$0xff]   ;;  %v869_v12 = vld [vmem:[%s1192_s2 + $0x28] sm:$0xff]  }
   0x5   :  { %v870_v13 = vld [vmem:[%s1193_s3 + $0x30] sm:$0xff]   ;;  %v872_v15 = vld [vmem:[%s1193_s3 + $0x38] sm:$0xff]   ;;  %v41_v17 = vld [vmem:[%s1191_s1] sm:$0x3] }
   0x6   :  { %754 = vmatpush3.bf16.msra.mxu0 %v860_v3  ;;  %v871_v14 = vld [vmem:[%s1192_s2 + $0x30] sm:$0xff]   ;;  %v873_v16 = vld [vmem:[%s1192_s2 + $0x38] sm:$0xff]   ;;  %v40_v18 = vld [vmem:[%s1190_s0] sm:$0x3]  ;;  %v59_v19 = vpack.c.bf16 %v41_v17, %v41_v17 }
   0x7   :  { %774 = vmatpush3.bf16.msra.mxu1 %v861_v4  ;;  %755 = vmatprep.subr.bf16.mxu0 %v926_v1  ;;  %v42_v20 = vpack.c.bf16 %v40_v18, %v40_v18  ;;  %v874_v21 = vld [vmem:[%s1194_s4] sm:$0xff]   ;;  %v876_v23 = vld [vmem:[%s1194_s4 + $0x8] sm:$0xff]   ;;  %v878_v25 = vld [vmem:[%s1194_s4 + $0x10] sm:$0xff]  }
   0x8   :  { %775 = vmatprep.subr.bf16.mxu1 %v926_v1  ;;  %v875_v22 = vld [vmem:[%s1195_s5] sm:$0xff]   ;;  %v877_v24 = vld [vmem:[%s1195_s5 + $0x8] sm:$0xff]  }
   0xa   :  { %756 = vmatpush3.bf16.msra.mxu0 %v862_v5 }
   0xb   :  { %776 = vmatpush3.bf16.msra.mxu1 %v863_v6  ;;  %757 = vmatprep.subr.bf16.mxu0 %v926_v1 }
   0xc   :  { %777 = vmatprep.subr.bf16.mxu1 %v926_v1 }
   0xe   :  { %758 = vmatpush3.bf16.msra.mxu0 %v864_v7 }
   0xf   :  { %778 = vmatpush3.bf16.msra.mxu1 %v865_v8  ;;  %759 = vmatprep.subr.bf16.mxu0 %v926_v1 }
  0x10   :  { %779 = vmatprep.subr.bf16.mxu1 %v926_v1 }
  0x12   :  { %760 = vmatpush3.bf16.msra.mxu0 %v866_v9 }
  0x13   :  { %780 = vmatpush3.bf16.msra.mxu1 %v867_v10  ;;  %761 = vmatprep.subr.bf16.mxu0 %v926_v1 }
  0x14   :  { %781 = vmatprep.subr.bf16.mxu1 %v926_v1 }
  0x16   :  { %762 = vmatpush3.bf16.msra.mxu0 %v868_v11 }
  0x17   :  { %782 = vmatpush3.bf16.msra.mxu1 %v869_v12  ;;  %763 = vmatprep.subr.bf16.mxu0 %v926_v1 }
  0x18   :  { %783 = vmatprep.subr.bf16.mxu1 %v926_v1 }
  0x1a   :  { %764 = vmatpush3.bf16.msra.mxu0 %v870_v13 }
  0x1b   :  { %784 = vmatpush3.bf16.msra.mxu1 %v871_v14  ;;  %765 = vmatprep.subr.bf16.mxu0 %v926_v1 }
  0x1c   :  { %785 = vmatprep.subr.bf16.mxu1 %v926_v1 }
  0x1e   :  { %766 = vmatpush3.bf16.msra.mxu0 %v872_v15 }
  0x1f   :  { %786 = vmatpush3.bf16.msra.mxu1 %v873_v16  ;;  %791 = vmatprep.subr.bf16.mxu0 %v926_v1 }
  0x20   :  { %811 = vmatprep.subr.bf16.mxu1 %v926_v1 }
  0x21   :  { %768 = vmatmul.mubr.bf16.vlgmr.msra.gmra.mrb[0].mxu0 %v59_v19 }
  0x22   :  { %788 = vmatmul.mubr.bf16.vlgmr.msra.gmra.mrb[0].mxu1 %v42_v20  ;;  %792 = vmatpush3.bf16.msra.mxu0 %v874_v21 }
  0x23   :  { %812 = vmatpush3.bf16.msra.mxu1 %v875_v22  ;;  %793 = vmatprep.subr.bf16.mxu0 %v926_v1 }
  0x24   :  { %813 = vmatprep.subr.bf16.mxu1 %v926_v1  ;;  %807 = vmatprep.mubr.msk.bf16.mxu0 %vm927_vm0, %v926_v1 }
  0x25   :  { %827 = vmatprep.mubr.msk.bf16.mxu1 %vm927_vm0, %v926_v1 }
  0x26   :  { %794 = vmatpush3.bf16.msra.mxu0 %v876_v23 }
  0x27   :  { %16 = vsyncpa [#allocation3], 0  ;;  %814 = vmatpush3.bf16.msra.mxu1 %v877_v24  ;;  %795 = vmatprep.subr.bf16.mxu0 %v926_v1  ;;  %v879_v26 = vld [vmem:[%s1195_s5 + $0x10] sm:$0xff]   ;;  %v880_v27 = vld [vmem:[%s1194_s4 + $0x18] sm:$0xff]   ;;  %v252_v33 = vsub.f32 %v40_v18, %v41_v17  ;;  %v360_v38 = vmul.f32 %v41_v17, %v40_v18  ;;  %vm516_vm1 = vcmask 523264   ;;  %vm644_vm2 = vcmask 17408  }
  0x28   :  { %815 = vmatprep.subr.bf16.mxu1 %v926_v1  ;;  %v881_v28 = vld [vmem:[%s1195_s5 + $0x18] sm:$0xff]   ;;  %v882_v29 = vld [vmem:[%s1194_s4 + $0x20] sm:$0xff]   ;;  %v884_v31 = vld [vmem:[%s1194_s4 + $0x28] sm:$0xff]  }
  0x29   :  { %v883_v30 = vld [vmem:[%s1195_s5 + $0x20] sm:$0xff]   ;;  %v885_v32 = vld [vmem:[%s1195_s5 + $0x28] sm:$0xff]   ;;  %v886_v34 = vld [vmem:[%s1194_s4 + $0x30] sm:$0xff]   ;;  %v253_v36 = vand.u32 2147483647, %v252_v33  ;;  %v361_v41 = vpack.c.bf16 %v360_v38, %v360_v38 }
  0x2a   :  { %796 = vmatpush3.bf16.msra.mxu0 %v878_v25  ;;  %v887_v35 = vld [vmem:[%s1195_s5 + $0x30] sm:$0xff]   ;;  %v888_v37 = vld [vmem:[%s1194_s4 + $0x38] sm:$0xff]   ;;  %v890_v42 = vld [vmem:[%s1197_s7] sm:$0xff]  }
  0x2b   :  { %816 = vmatpush3.bf16.msra.mxu1 %v879_v26  ;;  %797 = vmatprep.subr.bf16.mxu0 %v926_v1  ;;  %v889_v39 = vld [vmem:[%s1195_s5 + $0x38] sm:$0xff]   ;;  %v254_v40 = vpack.c.bf16 %v253_v36, %v253_v36  ;;  %v891_v43 = vld [vmem:[%s1197_s7 + $0x8] sm:$0xff]   ;;  %v892_v44 = vld [vmem:[%s1197_s7 + $0x10] sm:$0xff]  }
  0x2c   :  { %817 = vmatprep.subr.bf16.mxu1 %v926_v1  ;;  %v893_v45 = vld [vmem:[%s1197_s7 + $0x18] sm:$0xff]   ;;  %v692_v59 = vld [vmem:[%s1196_s6] ss:$0 sm:$0xff]  ;;  %v895_v7 = vld [vmem:[%s1199_s9 + $0x8] sm:$0xff]  }
  0x2d   :  { %v894_v6 = vld [vmem:[%s1199_s9] sm:$0xff]   ;;  %v896_v8 = vld [vmem:[%s1199_s9 + $0x10] sm:$0xff]   ;;  %v897_v9 = vld [vmem:[%s1199_s9 + $0x18] sm:$0xff]   ;;  %s928_s9 = smov [#allocation2]  }
  0x2e   :  { %798 = vmatpush3.bf16.msra.mxu0 %v880_v27  ;;  %v693_v10 = vld [vmem:[%s1198_s8] ss:$0 sm:$0xff]  ;;  %s652_s16 = sshll.u32 %s928_s9, 4  ;;  %s653_s16 = int_to_ptr.vmem [resolvable:$true] %s652_s16 }
  0x2f   :  { %818 = vmatpush3.bf16.msra.mxu1 %v881_v28  ;;  %799 = vmatprep.subr.bf16.mxu0 %v926_v1  ;;  %s902_s8 = scalar_lea.vmem %s653_s16, 32  ;;  %p907_p1 = scmp.lt.s32.totalorder %s653_s16, %s653_s16 }
  0x30   :  { %819 = vmatprep.subr.bf16.mxu1 %v926_v1  ;;  %p903_p0 = scmp.ne.s32.totalorder %s653_s16, %s902_s8  ;;  %p908_p2 = scmp.lt.s32.totalorder %s902_s8, %s902_s8 }
  0x32   :  { %800 = vmatpush3.bf16.msra.mxu0 %v882_v29  ;;  %p909_p3 = por %p908_p2, %p907_p1 }
  0x33   :  { %820 = vmatpush3.bf16.msra.mxu1 %v883_v30  ;;  %801 = vmatprep.subr.bf16.mxu0 %v926_v1 }
  0x34   :  { %821 = vmatprep.subr.bf16.mxu1 %v926_v1  ;;  %p910_p4 = pnand %p909_p3, %p903_p0 }
  0x36   :  { %802 = vmatpush3.bf16.msra.mxu0 %v884_v31 }
  0x37   :  { %822 = vmatpush3.bf16.msra.mxu1 %v885_v32  ;;  %803 = vmatprep.subr.bf16.mxu0 %v926_v1 }
  0x38   :  { %823 = vmatprep.subr.bf16.mxu1 %v926_v1 }
  0x3a   :  { %804 = vmatpush3.bf16.msra.mxu0 %v886_v34 }
  0x3b   :  { %824 = vmatpush3.bf16.msra.mxu1 %v887_v35  ;;  %805 = vmatprep.subr.bf16.mxu0 %v926_v1 }
  0x3c   :  { %825 = vmatprep.subr.bf16.mxu1 %v926_v1 }
  0x3e   :  { %806 = vmatpush3.bf16.msra.mxu0 %v888_v37 }
  0x3f   :  { %826 = vmatpush3.bf16.msra.mxu1 %v889_v39  ;;  %831 = vmatprep.subr.bf16.mxu0 %v926_v1 }
  0x40   :  { %843 = vmatprep.subr.bf16.mxu1 %v926_v1 }
  0x41   :  { %808 = vmatmul.mubr.bf16.vlgmr.msra.gmra.mrb[4].mxu0 %v254_v40 }
  0x42   :  { %828 = vmatmul.mubr.bf16.vlgmr.msra.gmra.mrb[4].mxu1 %v361_v41  ;;  %839 = vmatprep.mubr.msk.bf16.mxu0 %vm927_vm0, %v926_v1 }
  0x43   :  { %851 = vmatprep.mubr.msk.bf16.mxu1 %vm927_vm0, %v926_v1  ;;  %832 = vmatpush3.bf16.msra.mxu0 %v890_v42 }
  0x44   :  { %833 = vmatprep.subr.bf16.mxu0 %v926_v1  ;;  %844 = vmatpush3.bf16.msra.mxu1 %v894_v6 }
  0x45   :  { %845 = vmatprep.subr.bf16.mxu1 %v926_v1 }
  0x47   :  { %834 = vmatpush3.bf16.msra.mxu0 %v891_v43 }
  0x48   :  { %835 = vmatprep.subr.bf16.mxu0 %v926_v1  ;;  %846 = vmatpush3.bf16.msra.mxu1 %v895_v7 }
  0x49   :  { %847 = vmatprep.subr.bf16.mxu1 %v926_v1 }
  0x4b   :  { %836 = vmatpush3.bf16.msra.mxu0 %v892_v44 }
  0x4c   :  { %837 = vmatprep.subr.bf16.mxu0 %v926_v1  ;;  %848 = vmatpush3.bf16.msra.mxu1 %v896_v8 }
  0x4d   :  { %849 = vmatprep.subr.bf16.mxu1 %v926_v1  ;;  %v699_v1 = vld [vmem:[%s1200_s10] ss:$0 sm:$0xff] }
  0x4f   :  { %838 = vmatpush3.bf16.msra.mxu0 %v893_v45 }
  0x50   :  { %850 = vmatpush3.bf16.msra.mxu1 %v897_v9 }
  0xf4   :  { %v158_v46 = vpop.f32.mrb[0].mxu0 }
  0xf5   :  { %v246_v47 = vpop.f32.mrb[0].mxu1  ;;  %v769_v48 = vpop.f32.mrb[1].mxu0 }
  0xf6   :  { %v247_v49 = vadd.f32 %v246_v47, %v158_v46  ;;  %v789_v50 = vpop.f32.mrb[1].mxu1  ;;  %v161_v51 = vpop.f32.mrb[2].mxu0 }
  0xf7   :  { %v249_v52 = vpop.f32.mrb[2].mxu1  ;;  %v770_v53 = vpop.f32.mrb[3].mxu0 }
  0xf8   :  { %v790_v54 = vpop.f32.mrb[3].mxu1 }
 0x114   :  { %v353_v55 = vpop.f32.mrb[4].mxu0 }
 0x115   :  { %v359_v56 = vadd.f32 %v353_v55, %v247_v49  ;;  %v460_v57 = vpop.f32.mrb[4].mxu1  ;;  %v809_v58 = vpop.f32.mrb[5].mxu0 }
 0x116   :  { %v829_v60 = vpop.f32.mrb[5].mxu1  ;;  %v356_v61 = vpop.f32.mrb[6].mxu0 }
 0x117   :  { %v466_v62 = vadd.f32 %v460_v57, %v359_v56  ;;  %v463_v63 = vpop.f32.mrb[6].mxu1  ;;  %v810_v0 = vpop.f32.mrb[7].mxu0 }
 0x118   :  { %v830_v2 = vpop.f32.mrb[7].mxu1 }
 0x119   :  { %v474_v3 = vadd.f32 %v692_v59, %v466_v62 }
 0x11b   :  { %898 = vtanh.f32 %v474_v3 }
 0x125   :  { %v899_v4 = vpop.eup %898 }
 0x126   :  { %v476_v5 = vpack.c.bf16 %v899_v4, %v899_v4 }
 0x128   :  { %840 = vmatmul.mubr.msk.bf16.vlgmr.msra.gmra.mrb[8].mxu0 %vm516_vm1, %v476_v5 }
 0x1fb   :  { %v554_v11 = vpop.f32.mrb[8].mxu0 }
 0x1fc   :  { %v555_v12 = vadd.f32 %v693_v10, %v554_v11  ;;  %v841_v13 = vpop.f32.mrb[9].mxu0 }
 0x1fd   :  { %v557_v14 = vpop.f32.mrb[10].mxu0 }
 0x1fe   :  { %900 = vtanh.f32 %v555_v12  ;;  %v842_v15 = vpop.f32.mrb[11].mxu0 }
 0x208   :  { %v901_v16 = vpop.eup %900 }
 0x209   :  { %v561_v17 = vpack.c.bf16 %v901_v16, %v901_v16 }
 0x20b   :  { %852 = vmatmul.mubr.msk.bf16.vlgmr.msra.gmra.mrb[8].mxu1 %vm516_vm1, %v561_v17 }
 0x2de   :  { %v638_v18 = vpop.f32.mrb[8].mxu1 }
 0x2df   :  { %v639_v19 = vadd.f32 %v699_v1, %v638_v18  ;;  %v853_v20 = vpop.f32.mrb[9].mxu1 }
 0x2e0   :  { %v641_v21 = vpop.f32.mrb[10].mxu1 }
 0x2e1   :  { %v854_v22 = vpop.f32.mrb[11].mxu1  ;;  %645 = vst.msk [vmem:[#allocation2] sm:$0x3] %vm644_vm2, %v639_v19 }
 0x2e2   :  { %913 = shalt.err (!%p910_p4)
}
 0x2e3   :  { %s914_s10 = scalar_lea.hbm %s1201_s11, 32 }
 0x2e4   :  { %p915_p5 = scmp.ne.s32.totalorder %s1201_s11, %s914_s10  ;;  %p918_p6 = scmp.lt.u32.totalorder %s914_s10, %s1201_s11 }
 0x2e6   :  { %p920_p7 = pnand %p918_p6, %p915_p5 }
 0x2e8   :  { %923 = shalt.err (!%p920_p7)
}
 0x2e9   :  { %655 = dma.vmem_to_hbm [thread:$0]  %s653_s16, 32, %s1201_s11, [#allocation3]  }
 0x2ea   :  { %924 = dma.done.wait [#allocation3], 32  }
 0x2eb   :  { %925 = vsyncadd [#allocation3], 4294967264 }
 0x2ec   :  { %659 = vsyncpa [#allocation3], 1 }

// kernel: nli_net_forward.2
= control target key start
LH: loop header
LB: loop body
LE: loop exit
PB: predicated region body
PF: predicated region fallthrough
CT: control target
= control target key end

     0   :  { %vm152_vm0 = vcmask 261120   ;;  %v57_v13 = vlaneseq  ;;  %vm427_vm11 = vcmask 1041409   ;;  %vm429_vm12 = vcmask 1042434   ;;  %s1952_s1 = inlined_call_operand.vmem [shape: bf16[32,32], index: 1, kind: input, shape index: {}]   ;;  %s1953_s3 = inlined_call_operand.vmem [shape: bf16[32,32], index: 3, kind: input, shape index: {}]   ;;  %s1954_s0 = inlined_call_operand.vmem [shape: bf16[32,32], index: 0, kind: input, shape index: {}]   ;;  %s1955_s2 = inlined_call_operand.vmem [shape: bf16[32,32], index: 2, kind: input, shape index: {}]   ;;  %s1956_s5 = inlined_call_operand.vmem [shape: bf16[32,32], index: 5, kind: input, shape index: {}]   ;;  %s1957_s7 = inlined_call_operand.vmem [shape: bf16[32,32], index: 7, kind: input, shape index: {}]   ;;  %s1958_s6 = inlined_call_operand.vmem [shape: bf16[32,32], index: 6, kind: input, shape index: {}]   ;;  %s1959_s4 = inlined_call_operand.vmem [shape: f32[1,32], index: 4, kind: input, shape index: {}]   ;;  %s1960_s17 = inlined_call_operand.vmem [shape: f32[4,128], index: 17, kind: output, shape index: {}]   ;;  %s1961_s9 = inlined_call_operand.vmem [shape: bf16[32,32], index: 9, kind: input, shape index: {}]   ;;  %s1962_s11 = inlined_call_operand.vmem [shape: bf16[32,32], index: 11, kind: input, shape index: {}]   ;;  %s1963_s10 = inlined_call_operand.vmem [shape: bf16[32,32], index: 10, kind: input, shape index: {}]   ;;  %s1964_s8 = inlined_call_operand.vmem [shape: f32[1,32], index: 8, kind: input, shape index: {}]   ;;  %s1965_s13 = inlined_call_operand.vmem [shape: bf16[32,32], index: 13, kind: input, shape index: {}]   ;;  %s1966_s15 = inlined_call_operand.vmem [shape: bf16[32,32], index: 15, kind: input, shape index: {}]   ;;  %s1967_s14 = inlined_call_operand.vmem [shape: bf16[32,32], index: 14, kind: input, shape index: {}]   ;;  %s1968_s12 = inlined_call_operand.vmem [shape: f32[1,32], index: 12, kind: input, shape index: {}]   ;;  %s1969_s16 = inlined_call_operand.vmem [shape: f32[1,32], index: 16, kind: input, shape index: {}]  }
   0x1   :  { %1972 = sst [smem:[#allocation2_spill]] %s1952_s1  ;;  %v1502_v3 = vld [vmem:[%s1954_s0] sm:$0xff]   ;;  %v1503_v4 = vld [vmem:[%s1954_s0 + $0x8] sm:$0xff]   ;;  %vm431_vm13 = vcmask 1043459   ;;  %vm434_vm14 = vcmask 257024   ;;  %vm720_vm15 = vcmask 519424  }
   0x2   :  { %1973 = sst [smem:[#allocation3_spill]] %s1953_s3  ;;  %s1974_s26 = sld [smem:[#allocation2_spill]]  ;;  %1404 = vmatprep.mubr.msk.bf16.mxu0 %vm152_vm0, %v1502_v3  ;;  %v1505_v6 = vld [vmem:[%s1955_s2] sm:$0xff]   ;;  %1412 = vmatprep.mubr.msk.bf16.mxu1 %vm152_vm0, %v1502_v3  ;;  %v1506_v7 = vld [vmem:[%s1955_s2 + $0x8] sm:$0xff]   ;;  %v1666_v14 = vshrl.u32 %v57_v13, 7 }
   0x3   :  { %s1975_s30 = sld [smem:[#allocation3_spill]]  ;;  %v1507_v8 = vld [vmem:[%s1956_s5] sm:$0xff]   ;;  %v1509_v10 = vld [vmem:[%s1956_s5 + $0x8] sm:$0xff]  }
   0x4   :  { %v1508_v9 = vld [vmem:[%s1957_s7] sm:$0xff]   ;;  %v1510_v11 = vld [vmem:[%s1957_s7 + $0x8] sm:$0xff]   ;;  %v60_v15 = vadd.s32 16, %v1666_v14  ;;  %v61_v16 = vadd.s32 24, %v1666_v14  ;;  %v59_v17 = vadd.s32 8, %v1666_v14  ;;  %v66_v18 = vand.u32 7, %v1666_v14 }
   0x5   :  { %v1663_v12 = vld [vmem:[%s1958_s6] sm:$0xff]   ;;  %vm277_vm1 = vcmp.lt.s32.totalorder %v1666_v14, 1  ;;  %vm359_vm4 = vcmp.lt.s32.totalorder %v1666_v14, 7 }
   0x6   :  { %v80_v20 = vand.u32 7, %v60_v15  ;;  %v87_v25 = vand.u32 7, %v61_v16  ;;  %v73_v26 = vand.u32 7, %v59_v17  ;;  %vm1673_vm2 = vcmp.eq.s32.totalorder %v66_v18, 0  ;;  %v1312_v60 = vld [vmem:[%s1959_s4] ss:$0 sm:$0xff] }
   0x7   :  { %vm1692_vm6 = vcmp.eq.s32.totalorder %v66_v18, 7 }
   0x8   :  { %v1499_v0 = vld [vmem:[%s1974_s26] sm:$0xff]   ;;  %v1500_v1 = vld [vmem:[%s1974_s26 + $0x8] sm:$0xff]   ;;  %vm1677_vm3 = vcmp.eq.s32.totalorder %v80_v20, 0  ;;  %vm1682_vm5 = vcmp.eq.s32.totalorder %v80_v20, 7  ;;  %vm1696_vm7 = vcmp.eq.s32.totalorder %v87_v25, 0  ;;  %vm1712_vm8 = vcmp.eq.s32.totalorder %v87_v25, 7 }
   0x9   :  { %1400 = vmatprep.subr.bf16.mxu0 %v1499_v0  ;;  %v1501_v2 = vld [vmem:[%s1975_s30] sm:$0xff]   ;;  %v1504_v5 = vld [vmem:[%s1975_s30 + $0x8] sm:$0xff]   ;;  %vm1716_vm9 = vcmp.eq.s32.totalorder %v73_v26, 0  ;;  %vm1731_vm10 = vcmp.eq.s32.totalorder %v73_v26, 7 }
   0xa   :  { %1401 = vmatpush3.bf16.msra.mxu0 %v1499_v0  ;;  %1408 = vmatprep.subr.bf16.mxu1 %v1501_v2 }
   0xb   :  { %1402 = vmatprep.subr.bf16.mxu0 %v1500_v1  ;;  %1409 = vmatpush3.bf16.msra.mxu1 %v1501_v2 }
   0xc   :  { %1410 = vmatprep.subr.bf16.mxu1 %v1504_v5 }
   0xe   :  { %1403 = vmatpush3.bf16.msra.mxu0 %v1500_v1 }
   0xf   :  { %1416 = vmatprep.subr.bf16.mxu0 %v1505_v6  ;;  %1411 = vmatpush3.bf16.msra.mxu1 %v1504_v5 }
  0x10   :  { %1424 = vmatprep.subr.bf16.mxu1 %v1507_v8 }
  0x11   :  { %1405 = vmatmul.mubr.msk.bf16.vlgmr.msra.gmra.mrb[0].mxu0 %vm152_vm0, %v1503_v4 }
  0x12   :  { %1417 = vmatpush3.bf16.msra.mxu0 %v1505_v6  ;;  %1420 = vmatprep.mubr.msk.bf16.mxu0 %vm152_vm0, %v1502_v3 }
  0x13   :  { %1413 = vmatmul.mubr.msk.bf16.vlgmr.msra.gmra.mrb[0].mxu1 %vm152_vm0, %v1503_v4  ;;  %1418 = vmatprep.subr.bf16.mxu0 %v1506_v7 }
  0x14   :  { %1425 = vmatpush3.bf16.msra.mxu1 %v1507_v8 }
  0x15   :  { %1426 = vmatprep.subr.bf16.mxu1 %v1509_v10 }
  0x16   :  { %1419 = vmatpush3.bf16.msra.mxu0 %v1506_v7 }
  0x17   :  { %1432 = vmatprep.subr.bf16.mxu0 %v1508_v9 }
  0x18   :  { %1427 = vmatpush3.bf16.msra.mxu1 %v1509_v10 }
  0x19   :  { %1421 = vmatmul.mubr.msk.bf16.vlgmr.msra.gmra.mrb[4].mxu0 %vm152_vm0, %v1503_v4  ;;  %1440 = vmatprep.subr.bf16.mxu1 %v1663_v12 }
  0x1a   :  { %1433 = vmatpush3.bf16.msra.mxu0 %v1508_v9 }
  0x1b   :  { %1434 = vmatprep.subr.bf16.mxu0 %v1510_v11 }
  0x1e   :  { %1435 = vmatpush3.bf16.msra.mxu0 %v1510_v11 }
  0xe4   :  { %v1406_v19 = vpop.f32.mrb[0].mxu0 }
  0xe5   :  { %v193_v21 = vpop.f32.mrb[1].mxu0  ;;  %v275_v27 = vrot.slane %v1406_v19, 7 }
  0xe6   :  { %v273_v22 = vrot.slane %v193_v21, 7  ;;  %v1407_v23 = vpop.f32.mrb[2].mxu0  ;;  %v1414_v24 = vpop.f32.mrb[0].mxu1 }
  0xe7   :  { %v276_v28 = vrot.slane %v1407_v23, 7  ;;  %v196_v29 = vpop.f32.mrb[3].mxu0  ;;  %v357_v30 = vrot.slane %v1414_v24, 1  ;;  %v258_v31 = vpop.f32.mrb[1].mxu1 }
  0xe8   :  { %v274_v33 = vrot.slane %v196_v29, 7  ;;  %v355_v34 = vrot.slane %v258_v31, 1  ;;  %v1415_v35 = vpop.f32.mrb[2].mxu1 }
  0xe9   :  { %v358_v37 = vrot.slane %v1415_v35, 1  ;;  %v261_v38 = vpop.f32.mrb[3].mxu1  ;;  %v281_v40 = vsel %vm277_vm1, %v276_v28, %v273_v22  ;;  %v278_v41 = vsel %vm277_vm1, %v275_v27, %v276_v28 }
  0xea   :  { %v356_v42 = vrot.slane %v261_v38, 1  ;;  %v279_v43 = vsel %vm277_vm1, %v274_v33, %v275_v27  ;;  %v280_v49 = vsel %vm277_vm1, %v273_v22, %v274_v33  ;;  %v290_v56 = vsel %vm1673_vm2, 0.0, %v281_v40 }
  0xeb   :  { %v292_v46 = vsel %vm1677_vm3, 0.0, %v279_v43  ;;  %v360_v47 = vsel %vm359_vm4, %v357_v30, %v358_v37  ;;  %v363_v48 = vsel %vm359_vm4, %v358_v37, %v355_v34  ;;  %v293_v62 = vsel %vm1696_vm7, 0.0, %v278_v41 }
  0xec   :  { %v1422_v50 = vpop.f32.mrb[4].mxu0  ;;  %v374_v51 = vsel %vm1682_vm5, 0.0, %v360_v47  ;;  %v362_v52 = vsel %vm359_vm4, %v355_v34, %v356_v42  ;;  %v361_v59 = vsel %vm359_vm4, %v356_v42, %v357_v30  ;;  %v291_v3 = vsel %vm1716_vm9, 0.0, %v280_v49  ;;  %v1512_v34 = vld [vmem:[%s1958_s6 + $0x8] sm:$0xff]  }
  0xed   :  { %v349_v55 = vadd.f32 %v1422_v50, %v292_v46  ;;  %v340_v57 = vpop.f32.mrb[5].mxu0  ;;  %v372_v58 = vsel %vm1692_vm6, 0.0, %v362_v52  ;;  %v375_v6 = vsel %vm1712_vm8, 0.0, %v363_v48  ;;  %v373_v10 = vsel %vm1731_vm10, 0.0, %v361_v59 }
  0xee   :  { %v341_v61 = vadd.f32 %v340_v57, %v290_v56  ;;  %v1423_v63 = vpop.f32.mrb[6].mxu0 }
  0xef   :  { %v378_v1 = vadd.f32 %v374_v51, %v349_v55  ;;  %v352_v2 = vadd.f32 %v1423_v63, %v293_v62  ;;  %v343_v4 = vpop.f32.mrb[7].mxu0  ;;  %v1514_v62 = vld [vmem:[%s1962_s11] sm:$0xff]   ;;  %v1515_v63 = vld [vmem:[%s1961_s9 + $0x8] sm:$0xff]  }
  0xf0   :  { %v376_v5 = vadd.f32 %v372_v58, %v341_v61  ;;  %v344_v7 = vadd.f32 %v343_v4, %v291_v3  ;;  %v1513_v61 = vld [vmem:[%s1961_s9] sm:$0xff]  }
  0xf1   :  { %v389_v8 = vadd.f32 %v1312_v60, %v378_v1  ;;  %v379_v9 = vadd.f32 %v375_v6, %v352_v2  ;;  %1448 = vmatprep.subr.bf16.mxu0 %v1513_v61  ;;  %v1516_v1 = vld [vmem:[%s1962_s11 + $0x8] sm:$0xff]   ;;  %v1776_v2 = vld [vmem:[%s1963_s10] sm:$0xff]  }
  0xf2   :  { %v387_v11 = vadd.f32 %v1312_v60, %v376_v5  ;;  %v377_v13 = vadd.f32 %v373_v10, %v344_v7 }
  0xf3   :  { %v393_v15 = vmax.f32 %v389_v8, 0.0  ;;  %v390_v16 = vadd.f32 %v1312_v60, %v379_v9 }
  0xf4   :  { %v391_v17 = vmax.f32 %v387_v11, 0.0  ;;  %v388_v18 = vadd.f32 %v1312_v60, %v377_v13 }
  0xf5   :  { %v409_v19 = vsel %vm152_vm0, %v393_v15, -inf  ;;  %v394_v20 = vmax.f32 %v390_v16, 0.0 }
  0xf6   :  { %v410_v21 = vrot.slane %v409_v19, 4  ;;  %v395_v22 = vsel %vm152_vm0, %v391_v17, -inf  ;;  %v392_v23 = vmax.f32 %v388_v18, 0.0 }
  0xf7   :  { %v396_v24 = vrot.slane %v395_v22, 4  ;;  %v416_v25 = vsel %vm152_vm0, %v394_v20, -inf  ;;  %v437_v26 = vpack.c.bf16 %v394_v20, %v393_v15 }
  0xf8   :  { %v411_v27 = vmax.f32 %v409_v19, %v410_v21  ;;  %v417_v28 = vrot.slane %v416_v25, 4  ;;  %v402_v29 = vsel %vm152_vm0, %v392_v23, -inf  ;;  %v436_v30 = vpack.c.bf16 %v392_v23, %v391_v17 }
  0xf9   :  { %v397_v31 = vmax.f32 %v395_v22, %v396_v24  ;;  %v403_v33 = vrot.slane %v402_v29, 4 }
  0xfa   :  { %v412_v35 = vrot.slane %v411_v27, 2  ;;  %v418_v37 = vmax.f32 %v416_v25, %v417_v28  ;;  %1428 = vmatprep.mubr.msk.bf16.mxu1 %vm152_vm0, %v436_v30  ;;  %1436 = vmatprep.mubr.msk.bf16.mxu0 %vm152_vm0, %v436_v30 }
  0xfb   :  { %v398_v38 = vrot.slane %v397_v31, 2  ;;  %v404_v40 = vmax.f32 %v402_v29, %v403_v33  ;;  %1429 = vmatmul.mubr.msk.bf16.vlgmr.msra.gmra.mrb[4].mxu1 %vm152_vm0, %v437_v26  ;;  %1437 = vmatmul.mubr.msk.bf16.vlgmr.msra.gmra.mrb[8].mxu0 %vm152_vm0, %v437_v26 }
  0xfc   :  { %v413_v41 = vmax.f32 %v411_v27, %v412_v35  ;;  %v419_v42 = vrot.slane %v418_v37, 2  ;;  %1441 = vmatpush3.bf16.msra.mxu1 %v1663_v12  ;;  %1444 = vmatprep.mubr.msk.bf16.mxu1 %vm152_vm0, %v436_v30 }
  0xfd   :  { %v399_v43 = vmax.f32 %v397_v31, %v398_v38  ;;  %v405_v46 = vrot.slane %v404_v40, 2  ;;  %1442 = vmatprep.subr.bf16.mxu1 %v1512_v34  ;;  %1449 = vmatpush3.bf16.msra.mxu0 %v1513_v61 }
  0xfe   :  { %v420_v47 = vmax.f32 %v418_v37, %v419_v42  ;;  %v414_v50 = vrot.slane %v413_v41, 1  ;;  %1450 = vmatprep.subr.bf16.mxu0 %v1515_v63  ;;  %v1325_v37 = vld [vmem:[%s1964_s8] ss:$0 sm:$0xff] }
  0xff   :  { %v400_v48 = vrot.slane %v399_v43, 1  ;;  %v406_v49 = vmax.f32 %v404_v40, %v405_v46 }
 0x100   :  { %1443 = vmatpush3.bf16.msra.mxu1 %v1512_v34  ;;  %v421_v51 = vrot.slane %v420_v47, 1  ;;  %v415_v57 = vmax.f32 %v413_v41, %v414_v50 }
 0x101   :  { %v407_v52 = vrot.slane %v406_v49, 1  ;;  %v401_v55 = vmax.f32 %v399_v43, %v400_v48  ;;  %1456 = vmatprep.subr.bf16.mxu1 %v1514_v62  ;;  %1451 = vmatpush3.bf16.msra.mxu0 %v1515_v63 }
 0x102   :  { %v422_v12 = vmax.f32 %v420_v47, %v421_v51  ;;  %1464 = vmatprep.subr.bf16.mxu0 %v1776_v2 }
 0x103   :  { %v408_v56 = vmax.f32 %v406_v49, %v407_v52  ;;  %1445 = vmatmul.mubr.msk.bf16.vlgmr.msra.gmra.mrb[8].mxu1 %vm152_vm0, %v437_v26 }
 0x104   :  { %1457 = vmatpush3.bf16.msra.mxu1 %v1514_v62 }
 0x105   :  { %v428_v58 = vsel %vm427_vm11, %v408_v56, %v401_v55  ;;  %1458 = vmatprep.subr.bf16.mxu1 %v1516_v1 }
 0x106   :  { %v430_v59 = vsel %vm429_vm12, %v415_v57, %v428_v58 }
 0x107   :  { %v432_v60 = vsel %vm431_vm13, %v422_v12, %v430_v59 }
 0x108   :  { %435 = vst.msk [vmem:[%s1960_s17] sm:$0xf] %vm434_vm14, %v432_v60  ;;  %1459 = vmatpush3.bf16.msra.mxu1 %v1516_v1  ;;  %vm1006_vm14 = vcmask 781824  }
 0x1ce   :  { %v1430_v3 = vpop.f32.mrb[4].mxu1  ;;  %v1438_v4 = vpop.f32.mrb[8].mxu0 }
 0x1cf   :  { %v498_v5 = vpop.f32.mrb[5].mxu1  ;;  %v563_v6 = vpop.f32.mrb[9].mxu0  ;;  %v580_v11 = vrot.slane %v1430_v3, 7  ;;  %v653_v13 = vrot.slane %v1438_v4, 1 }
 0x1d0   :  { %v578_v7 = vrot.slane %v498_v5, 7  ;;  %v651_v8 = vrot.slane %v563_v6, 1  ;;  %v1431_v9 = vpop.f32.mrb[6].mxu1  ;;  %v1439_v10 = vpop.f32.mrb[10].mxu0 }
 0x1d1   :  { %v581_v15 = vrot.slane %v1431_v9, 7  ;;  %v654_v16 = vrot.slane %v1439_v10, 1  ;;  %v501_v17 = vpop.f32.mrb[7].mxu1  ;;  %v566_v18 = vpop.f32.mrb[11].mxu0 }
 0x1d2   :  { %v579_v19 = vrot.slane %v501_v17, 7  ;;  %v652_v20 = vrot.slane %v566_v18, 1 }
 0x1d3   :  { %v655_v21 = vsel %vm359_vm4, %v653_v13, %v654_v16  ;;  %v585_v22 = vsel %vm277_vm1, %v581_v15, %v578_v7  ;;  %v582_v23 = vsel %vm277_vm1, %v580_v11, %v581_v15  ;;  %v658_v24 = vsel %vm359_vm4, %v654_v16, %v651_v8  ;;  %v1518_v16 = vld [vmem:[%s1963_s10 + $0x8] sm:$0xff]   ;;  %s1525_s10 = smov 32  }
 0x1d4   :  { %v583_v25 = vsel %vm277_vm1, %v579_v19, %v580_v11  ;;  %v657_v26 = vsel %vm359_vm4, %v651_v8, %v652_v20  ;;  %v584_v29 = vsel %vm277_vm1, %v578_v7, %v579_v19  ;;  %v656_v30 = vsel %vm359_vm4, %v652_v20, %v653_v13 }
 0x1d5   :  { %v588_v27 = vsel %vm1677_vm3, 0.0, %v583_v25  ;;  %v586_v33 = vsel %vm1673_vm2, 0.0, %v585_v22  ;;  %v661_v35 = vsel %vm1682_vm5, 0.0, %v655_v21  ;;  %v589_v40 = vsel %vm1696_vm7, 0.0, %v582_v23 }
 0x1d6   :  { %v1446_v28 = vpop.f32.mrb[8].mxu1  ;;  %v659_v43 = vsel %vm1692_vm6, 0.0, %v657_v26  ;;  %v587_v47 = vsel %vm1716_vm9, 0.0, %v584_v29  ;;  %v662_v50 = vsel %vm1712_vm8, 0.0, %v658_v24  ;;  %v660_v56 = vsel %vm1731_vm10, 0.0, %v656_v30 }
 0x1d7   :  { %v645_v31 = vadd.f32 %v1446_v28, %v588_v27  ;;  %v636_v34 = vpop.f32.mrb[9].mxu1 }
 0x1d8   :  { %v637_v38 = vadd.f32 %v636_v34, %v586_v33  ;;  %v1447_v41 = vpop.f32.mrb[10].mxu1 }
 0x1d9   :  { %v665_v42 = vadd.f32 %v661_v35, %v645_v31  ;;  %v648_v46 = vadd.f32 %v1447_v41, %v589_v40  ;;  %v639_v48 = vpop.f32.mrb[11].mxu1  ;;  %v1519_v40 = vld [vmem:[%s1965_s13] sm:$0xff]  }
 0x1da   :  { %v663_v49 = vadd.f32 %v659_v43, %v637_v38  ;;  %v640_v51 = vadd.f32 %v639_v48, %v587_v47  ;;  %v1520_v41 = vld [vmem:[%s1966_s15] sm:$0xff]   ;;  %1472 = vmatprep.subr.bf16.mxu1 %v1519_v40  ;;  %v1522_v43 = vld [vmem:[%s1966_s15 + $0x8] sm:$0xff]  }
 0x1db   :  { %v676_v52 = vadd.f32 %v1325_v37, %v665_v42  ;;  %v666_v55 = vadd.f32 %v662_v50, %v648_v46  ;;  %v1521_v42 = vld [vmem:[%s1965_s13 + $0x8] sm:$0xff]   ;;  %v1846_v46 = vld [vmem:[%s1967_s14] sm:$0xff]  }
 0x1dc   :  { %v674_v57 = vadd.f32 %v1325_v37, %v663_v49  ;;  %v664_v12 = vadd.f32 %v660_v56, %v640_v51 }
 0x1dd   :  { %v680_v58 = vmax.f32 %v676_v52, 0.0  ;;  %v677_v59 = vadd.f32 %v1325_v37, %v666_v55 }
 0x1de   :  { %v678_v60 = vmax.f32 %v674_v57, 0.0  ;;  %v675_v61 = vadd.f32 %v1325_v37, %v664_v12 }
 0x1df   :  { %v696_v62 = vsel %vm152_vm0, %v680_v58, -inf  ;;  %v681_v63 = vmax.f32 %v677_v59, 0.0 }
 0x1e0   :  { %v697_v1 = vrot.slane %v696_v62, 4  ;;  %v682_v3 = vsel %vm152_vm0, %v678_v60, -inf  ;;  %v679_v4 = vmax.f32 %v675_v61, 0.0 }
 0x1e1   :  { %v683_v5 = vrot.slane %v682_v3, 4  ;;  %v703_v6 = vsel %vm152_vm0, %v681_v63, -inf  ;;  %v723_v7 = vpack.c.bf16 %v681_v63, %v680_v58 }
 0x1e2   :  { %v698_v8 = vmax.f32 %v696_v62, %v697_v1  ;;  %v704_v9 = vrot.slane %v703_v6, 4  ;;  %v689_v10 = vsel %vm152_vm0, %v679_v4, -inf  ;;  %v722_v11 = vpack.c.bf16 %v679_v4, %v678_v60 }
 0x1e3   :  { %v684_v13 = vmax.f32 %v682_v3, %v683_v5  ;;  %v690_v15 = vrot.slane %v689_v10, 4 }
 0x1e4   :  { %v699_v17 = vrot.slane %v698_v8, 2  ;;  %v705_v18 = vmax.f32 %v703_v6, %v704_v9  ;;  %1452 = vmatprep.mubr.msk.bf16.mxu0 %vm152_vm0, %v722_v11  ;;  %1460 = vmatprep.mubr.msk.bf16.mxu1 %vm152_vm0, %v722_v11 }
 0x1e5   :  { %v685_v19 = vrot.slane %v684_v13, 2  ;;  %v691_v20 = vmax.f32 %v689_v10, %v690_v15  ;;  %1453 = vmatmul.mubr.msk.bf16.vlgmr.msra.gmra.mrb[12].mxu0 %vm152_vm0, %v723_v7  ;;  %1461 = vmatmul.mubr.msk.bf16.vlgmr.msra.gmra.mrb[12].mxu1 %vm152_vm0, %v723_v7 }
 0x1e6   :  { %1465 = vmatpush3.bf16.msra.mxu0 %v1776_v2  ;;  %1468 = vmatprep.mubr.msk.bf16.mxu0 %vm152_vm0, %v722_v11  ;;  %v700_v21 = vmax.f32 %v698_v8, %v699_v17  ;;  %v706_v22 = vrot.slane %v705_v18, 2 }
 0x1e7   :  { %v686_v23 = vmax.f32 %v684_v13, %v685_v19  ;;  %v692_v24 = vrot.slane %v691_v20, 2  ;;  %1466 = vmatprep.subr.bf16.mxu0 %v1518_v16  ;;  %1473 = vmatpush3.bf16.msra.mxu1 %v1519_v40  ;;  %v1338_v19 = vld [vmem:[%s1968_s12] ss:$0 sm:$0xff] }
 0x1e8   :  { %v707_v25 = vmax.f32 %v705_v18, %v706_v22  ;;  %v701_v28 = vrot.slane %v700_v21, 1  ;;  %1474 = vmatprep.subr.bf16.mxu1 %v1521_v42 }
 0x1e9   :  { %v693_v26 = vmax.f32 %v691_v20, %v692_v24  ;;  %v687_v27 = vrot.slane %v686_v23, 1 }
 0x1ea   :  { %1467 = vmatpush3.bf16.msra.mxu0 %v1518_v16  ;;  %v708_v30 = vrot.slane %v707_v25, 1  ;;  %v702_v34 = vmax.f32 %v700_v21, %v701_v28 }
 0x1eb   :  { %v694_v29 = vrot.slane %v693_v26, 1  ;;  %v688_v31 = vmax.f32 %v686_v23, %v687_v27  ;;  %1480 = vmatprep.subr.bf16.mxu0 %v1520_v41  ;;  %1475 = vmatpush3.bf16.msra.mxu1 %v1521_v42 }
 0x1ec   :  { %v709_v2 = vmax.f32 %v707_v25, %v708_v30  ;;  %1488 = vmatprep.subr.bf16.mxu1 %v1846_v46 }
 0x1ed   :  { %1469 = vmatmul.mubr.msk.bf16.vlgmr.msra.gmra.mrb[16].mxu0 %vm152_vm0, %v723_v7  ;;  %v695_v33 = vmax.f32 %v693_v26, %v694_v29 }
 0x1ee   :  { %1481 = vmatpush3.bf16.msra.mxu0 %v1520_v41 }
 0x1ef   :  { %v714_v35 = vsel %vm427_vm11, %v695_v33, %v688_v31  ;;  %1482 = vmatprep.subr.bf16.mxu0 %v1522_v43 }
 0x1f0   :  { %v715_v37 = vsel %vm429_vm12, %v702_v34, %v714_v35 }
 0x1f1   :  { %v716_v38 = vsel %vm431_vm13, %v709_v2, %v715_v37 }
 0x1f2   :  { %717 = vrot.lane.b32.xlu0 %v716_v38, %s1525_s10  ;;  %1483 = vmatpush3.bf16.msra.mxu0 %v1522_v43 }
 0x264   :  { %v718_v47 = vpop.permute.xlu0 %717 }
 0x265   :  { %721 = vst.msk [vmem:[%s1960_s17] sm:$0xf] %vm720_vm15, %v718_v47 }
 0x2b8   :  { %v1454_v48 = vpop.f32.mrb[12].mxu0  ;;  %v1462_v49 = vpop.f32.mrb[12].mxu1 }
 0x2b9   :  { %v784_v50 = vpop.f32.mrb[13].mxu0  ;;  %v849_v51 = vpop.f32.mrb[13].mxu1  ;;  %v866_v12 = vrot.slane %v1454_v48, 7  ;;  %v939_v58 = vrot.slane %v1462_v49, 1 }
 0x2ba   :  { %v864_v52 = vrot.slane %v784_v50, 7  ;;  %v937_v55 = vrot.slane %v849_v51, 1  ;;  %v1455_v56 = vpop.f32.mrb[14].mxu0  ;;  %v1463_v57 = vpop.f32.mrb[14].mxu1 }
 0x2bb   :  { %v867_v59 = vrot.slane %v1455_v56, 7  ;;  %v940_v60 = vrot.slane %v1463_v57, 1  ;;  %v787_v61 = vpop.f32.mrb[15].mxu0  ;;  %v852_v62 = vpop.f32.mrb[15].mxu1 }
 0x2bc   :  { %v865_v63 = vrot.slane %v787_v61, 7  ;;  %v938_v1 = vrot.slane %v852_v62, 1 }
 0x2bd   :  { %v941_v3 = vsel %vm359_vm4, %v939_v58, %v940_v60  ;;  %v871_v4 = vsel %vm277_vm1, %v867_v59, %v864_v52  ;;  %v868_v5 = vsel %vm277_vm1, %v866_v12, %v867_v59  ;;  %v944_v6 = vsel %vm359_vm4, %v940_v60, %v937_v55  ;;  %v1524_v60 = vld [vmem:[%s1967_s14 + $0x8] sm:$0xff]   ;;  %s1526_s14 = smov 64  }
 0x2be   :  { %v869_v7 = vsel %vm277_vm1, %v865_v63, %v866_v12  ;;  %v943_v8 = vsel %vm359_vm4, %v937_v55, %v938_v1  ;;  %v870_v11 = vsel %vm277_vm1, %v864_v52, %v865_v63  ;;  %v942_v13 = vsel %vm359_vm4, %v938_v1, %v939_v58 }
 0x2bf   :  { %v874_v9 = vsel %vm1677_vm3, 0.0, %v869_v7  ;;  %v872_v16 = vsel %vm1673_vm2, 0.0, %v871_v4  ;;  %v947_v18 = vsel %vm1682_vm5, 0.0, %v941_v3  ;;  %v875_v21 = vsel %vm1696_vm7, 0.0, %v868_v5 }
 0x2c0   :  { %v1470_v10 = vpop.f32.mrb[16].mxu0  ;;  %v945_v24 = vsel %vm1692_vm6, 0.0, %v943_v8  ;;  %v873_v26 = vsel %vm1716_vm9, 0.0, %v870_v11  ;;  %v948_v29 = vsel %vm1712_vm8, 0.0, %v944_v6  ;;  %v946_v34 = vsel %vm1731_vm10, 0.0, %v942_v13 }
 0x2c1   :  { %v931_v15 = vadd.f32 %v1470_v10, %v874_v9  ;;  %v922_v17 = vpop.f32.mrb[17].mxu0 }
 0x2c2   :  { %v923_v20 = vadd.f32 %v922_v17, %v872_v16  ;;  %v1471_v22 = vpop.f32.mrb[18].mxu0 }
 0x2c3   :  { %v951_v23 = vadd.f32 %v947_v18, %v931_v15  ;;  %v934_v25 = vadd.f32 %v1471_v22, %v875_v21  ;;  %v925_v27 = vpop.f32.mrb[19].mxu0 }
 0x2c4   :  { %v949_v28 = vadd.f32 %v945_v24, %v923_v20  ;;  %v926_v30 = vadd.f32 %v925_v27, %v873_v26 }
 0x2c5   :  { %v962_v31 = vadd.f32 %v1338_v19, %v951_v23  ;;  %v952_v33 = vadd.f32 %v948_v29, %v934_v25 }
 0x2c6   :  { %v960_v2 = vadd.f32 %v1338_v19, %v949_v28  ;;  %v950_v35 = vadd.f32 %v946_v34, %v926_v30 }
 0x2c7   :  { %v966_v37 = vmax.f32 %v962_v31, 0.0  ;;  %v963_v38 = vadd.f32 %v1338_v19, %v952_v33 }
 0x2c8   :  { %v964_v40 = vmax.f32 %v960_v2, 0.0  ;;  %v961_v41 = vadd.f32 %v1338_v19, %v950_v35 }
 0x2c9   :  { %v982_v42 = vsel %vm152_vm0, %v966_v37, -inf  ;;  %v967_v43 = vmax.f32 %v963_v38, 0.0 }
 0x2ca   :  { %v983_v47 = vrot.slane %v982_v42, 4  ;;  %v968_v48 = vsel %vm152_vm0, %v964_v40, -inf  ;;  %v965_v49 = vmax.f32 %v961_v41, 0.0 }
 0x2cb   :  { %v969_v50 = vrot.slane %v968_v48, 4  ;;  %v989_v51 = vsel %vm152_vm0, %v967_v43, -inf  ;;  %v1009_v52 = vpack.c.bf16 %v967_v43, %v966_v37 }
 0x2cc   :  { %v984_v55 = vmax.f32 %v982_v42, %v983_v47  ;;  %v990_v56 = vrot.slane %v989_v51, 4  ;;  %v975_v57 = vsel %vm152_vm0, %v965_v49, -inf  ;;  %v1008_v12 = vpack.c.bf16 %v965_v49, %v964_v40 }
 0x2cd   :  { %v970_v58 = vmax.f32 %v968_v48, %v969_v50  ;;  %v976_v59 = vrot.slane %v975_v57, 4 }
 0x2ce   :  { %v985_v61 = vrot.slane %v984_v55, 2  ;;  %v991_v62 = vmax.f32 %v989_v51, %v990_v56  ;;  %1476 = vmatprep.mubr.msk.bf16.mxu1 %vm152_vm0, %v1008_v12  ;;  %1484 = vmatprep.mubr.msk.bf16.mxu0 %vm152_vm0, %v1008_v12 }
 0x2cf   :  { %v971_v63 = vrot.slane %v970_v58, 2  ;;  %v977_v1 = vmax.f32 %v975_v57, %v976_v59  ;;  %1477 = vmatmul.mubr.msk.bf16.vlgmr.msra.gmra.mrb[16].mxu1 %vm152_vm0, %v1009_v52  ;;  %1485 = vmatmul.mubr.msk.bf16.vlgmr.msra.gmra.mrb[20].mxu0 %vm152_vm0, %v1009_v52 }
 0x2d0   :  { %v986_v3 = vmax.f32 %v984_v55, %v985_v61  ;;  %v992_v4 = vrot.slane %v991_v62, 2  ;;  %1489 = vmatpush3.bf16.msra.mxu1 %v1846_v46  ;;  %1492 = vmatprep.mubr.msk.bf16.mxu1 %vm152_vm0, %v1008_v12 }
 0x2d1   :  { %v972_v5 = vmax.f32 %v970_v58, %v971_v63  ;;  %v978_v6 = vrot.slane %v977_v1, 2  ;;  %1490 = vmatprep.subr.bf16.mxu1 %v1524_v60  ;;  %v1351_v58 = vld [vmem:[%s1969_s16] ss:$0 sm:$0xff]  ;;  %s1527_s16 = smov 96  }
 0x2d2   :  { %v993_v7 = vmax.f32 %v991_v62, %v992_v4  ;;  %v987_v10 = vrot.slane %v986_v3, 1 }
 0x2d3   :  { %v973_v8 = vrot.slane %v972_v5, 1  ;;  %v979_v9 = vmax.f32 %v977_v1, %v978_v6 }
 0x2d4   :  { %1491 = vmatpush3.bf16.msra.mxu1 %v1524_v60  ;;  %v994_v13 = vrot.slane %v993_v7, 1  ;;  %v988_v17 = vmax.f32 %v986_v3, %v987_v10 }
 0x2d5   :  { %v980_v11 = vrot.slane %v979_v9, 1  ;;  %v974_v15 = vmax.f32 %v972_v5, %v973_v8 }
 0x2d6   :  { %v995_v18 = vmax.f32 %v993_v7, %v994_v13 }
 0x2d7   :  { %1493 = vmatmul.mubr.msk.bf16.vlgmr.msra.gmra.mrb[20].mxu1 %vm152_vm0, %v1009_v52  ;;  %v981_v16 = vmax.f32 %v979_v9, %v980_v11 }
 0x2d9   :  { %v1000_v46 = vsel %vm427_vm11, %v981_v16, %v974_v15 }
 0x2da   :  { %v1001_v19 = vsel %vm429_vm12, %v988_v17, %v1000_v46 }
 0x2db   :  { %v1002_v20 = vsel %vm431_vm13, %v995_v18, %v1001_v19 }
 0x2dc   :  { %1003 = vrot.lane.b32.xlu0 %v1002_v20, %s1526_s14 }
 0x34e   :  { %v1004_v21 = vpop.permute.xlu0 %1003 }
 0x34f   :  { %1007 = vst.msk [vmem:[%s1960_s17] sm:$0xf] %vm1006_vm14, %v1004_v21 }
 0x3a2   :  { %v1478_v22 = vpop.f32.mrb[16].mxu1  ;;  %v1486_v23 = vpop.f32.mrb[20].mxu0 }
 0x3a3   :  { %v1070_v24 = vpop.f32.mrb[17].mxu1  ;;  %v1135_v25 = vpop.f32.mrb[21].mxu0  ;;  %v1152_v30 = vrot.slane %v1478_v22, 7  ;;  %v1225_v31 = vrot.slane %v1486_v23, 1 }
 0x3a4   :  { %v1150_v26 = vrot.slane %v1070_v24, 7  ;;  %v1223_v27 = vrot.slane %v1135_v25, 1  ;;  %v1479_v28 = vpop.f32.mrb[18].mxu1  ;;  %v1487_v29 = vpop.f32.mrb[22].mxu0 }
 0x3a5   :  { %v1153_v33 = vrot.slane %v1479_v28, 7  ;;  %v1226_v34 = vrot.slane %v1487_v29, 1  ;;  %v1073_v2 = vpop.f32.mrb[19].mxu1  ;;  %v1138_v35 = vpop.f32.mrb[23].mxu0 }
 0x3a6   :  { %v1151_v37 = vrot.slane %v1073_v2, 7  ;;  %v1224_v38 = vrot.slane %v1138_v35, 1 }
 0x3a7   :  { %v1227_v40 = vsel %vm359_vm4, %v1225_v31, %v1226_v34  ;;  %v1157_v41 = vsel %vm277_vm1, %v1153_v33, %v1150_v26  ;;  %v1154_v42 = vsel %vm277_vm1, %v1152_v30, %v1153_v33  ;;  %v1230_v43 = vsel %vm359_vm4, %v1226_v34, %v1223_v27 }
 0x3a8   :  { %v1228_v47 = vsel %vm359_vm4, %v1224_v38, %v1225_v31  ;;  %v1229_v48 = vsel %vm359_vm4, %v1223_v27, %v1224_v38  ;;  %v1155_v49 = vsel %vm277_vm1, %v1151_v37, %v1152_v30  ;;  %v1156_v52 = vsel %vm277_vm1, %v1150_v26, %v1151_v37 }
 0x3a9   :  { %v1160_v50 = vsel %vm1677_vm3, 0.0, %v1155_v49  ;;  %v1158_v56 = vsel %vm1673_vm2, 0.0, %v1157_v41  ;;  %v1233_v12 = vsel %vm1682_vm5, 0.0, %v1227_v40  ;;  %v1161_v36 = vsel %vm1696_vm7, 0.0, %v1154_v42 }
 0x3aa   :  { %v1494_v51 = vpop.f32.mrb[20].mxu1  ;;  %v1231_v14 = vsel %vm1692_vm6, 0.0, %v1229_v48  ;;  %v1159_v32 = vsel %vm1716_vm9, 0.0, %v1156_v52  ;;  %v1234_v1 = vsel %vm1712_vm8, 0.0, %v1230_v43  ;;  %v1232_v45 = vsel %vm1731_vm10, 0.0, %v1228_v47 }
 0x3ab   :  { %v1217_v55 = vadd.f32 %v1494_v51, %v1160_v50  ;;  %v1208_v57 = vpop.f32.mrb[21].mxu1 }
 0x3ac   :  { %v1209_v59 = vadd.f32 %v1208_v57, %v1158_v56  ;;  %v1495_v60 = vpop.f32.mrb[22].mxu1 }
 0x3ad   :  { %v1237_v61 = vadd.f32 %v1233_v12, %v1217_v55  ;;  %v1220_v62 = vadd.f32 %v1495_v60, %v1161_v36  ;;  %v1211_v63 = vpop.f32.mrb[23].mxu1 }
 0x3ae   :  { %v1235_v39 = vadd.f32 %v1231_v14, %v1209_v59  ;;  %v1212_v3 = vadd.f32 %v1211_v63, %v1159_v32 }
 0x3af   :  { %v1248_v4 = vadd.f32 %v1351_v58, %v1237_v61  ;;  %v1238_v5 = vadd.f32 %v1234_v1, %v1220_v62 }
 0x3b0   :  { %v1246_v6 = vadd.f32 %v1351_v58, %v1235_v39  ;;  %v1236_v7 = vadd.f32 %v1232_v45, %v1212_v3 }
 0x3b1   :  { %v1252_v8 = vmax.f32 %v1248_v4, 0.0  ;;  %v1249_v44 = vadd.f32 %v1351_v58, %v1238_v5 }
 0x3b2   :  { %v1250_v9 = vmax.f32 %v1246_v6, 0.0  ;;  %v1247_v10 = vadd.f32 %v1351_v58, %v1236_v7 }
 0x3b3   :  { %v1268_v54 = vsel %vm152_vm0, %v1252_v8, -inf  ;;  %v1253_v11 = vmax.f32 %v1249_v44, 0.0 }
 0x3b4   :  { %v1269_v13 = vrot.slane %v1268_v54, 4  ;;  %v1254_v15 = vsel %vm152_vm0, %v1250_v9, -inf  ;;  %v1251_v53 = vmax.f32 %v1247_v10, 0.0 }
 0x3b5   :  { %v1255_v16 = vrot.slane %v1254_v15, 4  ;;  %v1275_v17 = vsel %vm152_vm0, %v1253_v11, -inf }
 0x3b6   :  { %v1270_v18 = vmax.f32 %v1268_v54, %v1269_v13  ;;  %v1276_v46 = vrot.slane %v1275_v17, 4  ;;  %v1261_v0 = vsel %vm152_vm0, %v1251_v53, -inf  ;;  %vm1292_vm0 = vcmask 1044224  }
 0x3b7   :  { %v1256_v19 = vmax.f32 %v1254_v15, %v1255_v16  ;;  %v1262_v20 = vrot.slane %v1261_v0, 4 }
 0x3b8   :  { %v1271_v21 = vrot.slane %v1270_v18, 2  ;;  %v1277_v22 = vmax.f32 %v1275_v17, %v1276_v46 }
 0x3b9   :  { %v1257_v23 = vrot.slane %v1256_v19, 2  ;;  %v1263_v24 = vmax.f32 %v1261_v0, %v1262_v20 }
 0x3ba   :  { %v1272_v25 = vmax.f32 %v1270_v18, %v1271_v21  ;;  %v1278_v26 = vrot.slane %v1277_v22, 2 }
 0x3bb   :  { %v1258_v27 = vmax.f32 %v1256_v19, %v1257_v23  ;;  %v1264_v28 = vrot.slane %v1263_v24, 2 }
 0x3bc   :  { %v1279_v29 = vmax.f32 %v1277_v22, %v1278_v26  ;;  %v1273_v33 = vrot.slane %v1272_v25, 1 }
 0x3bd   :  { %v1265_v30 = vmax.f32 %v1263_v24, %v1264_v28  ;;  %v1259_v31 = vrot.slane %v1258_v27, 1 }
 0x3be   :  { %v1280_v2 = vrot.slane %v1279_v29, 1  ;;  %v1274_v38 = vmax.f32 %v1272_v25, %v1273_v33 }
 0x3bf   :  { %v1266_v34 = vrot.slane %v1265_v30, 1  ;;  %v1260_v35 = vmax.f32 %v1258_v27, %v1259_v31 }
 0x3c0   :  { %v1281_v40 = vmax.f32 %v1279_v29, %v1280_v2 }
 0x3c1   :  { %v1267_v37 = vmax.f32 %v1265_v30, %v1266_v34 }
 0x3c3   :  { %v1286_v41 = vsel %vm427_vm11, %v1267_v37, %v1260_v35 }
 0x3c4   :  { %v1287_v42 = vsel %vm429_vm12, %v1274_v38, %v1286_v41 }
 0x3c5   :  { %v1288_v43 = vsel %vm431_vm13, %v1281_v40, %v1287_v42 }
 0x3c6   :  { %1289 = vrot.lane.b32.xlu1 %v1288_v43, %s1527_s16 }
 0x438   :  { %v1290_v47 = vpop.permute.xlu1 %1289 }
 0x439   :  { %1293 = vst.msk [vmem:[%s1960_s17] sm:$0xf] %vm1292_vm0, %v1290_v47 }

</bundles_post_ra>
